<compile_context>
chip_gen: v7x
topology: tpu7x:2x2x1
jax: 0.10.0
libtpu: 0.0.40
codegen_flags: <defaults>
</compile_context>

<pallas_src>
import functools

import jax
import jax.numpy as jnp
from jax.experimental import pallas as pl
from jax.experimental.pallas import tpu as pltpu

COUT_PAD = 128  # lane-dense output slab width (all couts here are <= 32)


def _round_up(x, m):
    return ((x + m - 1) // m) * m


# ----------------------------------------------------------------------------
# Pallas kernel: sum of im2col matmuls (bf16 MXU) + residual + activation (f32)
# ----------------------------------------------------------------------------
def _fused_conv_kernel(*refs, n_inputs, act, has_residual):
    """refs = (p0, w0, p1, w1, ..., [res], out).

    p_i : (BM, Kp_i)      bf16 im2col patches (input 0 carries a ones-column
                          so the bias rides in as an extra weight row)
    w_i : (Kp_i, 128)     bf16 weights, cout zero-padded to 128 lanes
    res : (BM, 128)       f32 residual (optional)
    out : (BM, 128)       f32 lane-dense output slab
    """
    out_ref = refs[-1]
    acc = jnp.dot(refs[0][...], refs[1][...], preferred_element_type=jnp.float32)
    for i in range(1, n_inputs):
        acc = acc + jnp.dot(refs[2 * i][...], refs[2 * i + 1][...],
                            preferred_element_type=jnp.float32)
    if has_residual:
        acc = acc + refs[2 * n_inputs][...]
    if act == "relu":
        acc = jnp.maximum(acc, 0.0)
    elif act == "sigmoid":
        acc = jax.nn.sigmoid(acc)
    out_ref[...] = acc.astype(out_ref.dtype)


def conv3x3(inputs, b, *, stride=1, act="none", residual=None):
    """3x3 conv, padding=1, stride in {1,2}.

    `inputs` is a list of (x_nhwc, w_hwio) pairs whose conv outputs are summed,
    which is exactly a conv over the channel-concatenation of the inputs
    (used to fuse the decoder skip-concat without materializing it).
    """
    N, H, W, _ = inputs[0][0].shape
    Ho, Wo = H // stride, W // stride
    M = N * Ho * Wo
    cout = inputs[0][1].shape[-1]

    patch_list, wmat_list, kpads = [], [], []
    for idx, (x, w) in enumerate(inputs):
        cin = x.shape[-1]
        xp = jnp.pad(x.astype(jnp.float32), ((0, 0), (1, 1), (1, 1), (0, 0)))
        # im2col only at strided output positions; tap order (kh, kw, cin)
        # matches w.reshape(9*cin, cout).
        taps = [xp[:, kh:kh + stride * Ho:stride, kw:kw + stride * Wo:stride, :]
                for kh in range(3) for kw in range(3)]
        p = jnp.concatenate(taps, axis=-1).reshape(M, 9 * cin)
        wm = w.reshape(9 * cin, cout)
        if idx == 0:
            # fold the bias into the matmul: ones-column x bias-row
            p = jnp.concatenate([p, jnp.ones((M, 1), jnp.float32)], axis=-1)
            wm = jnp.concatenate([wm, b.reshape(1, cout).astype(jnp.float32)],
                                 axis=0)
        k = p.shape[-1]
        kp = _round_up(k, 128) if k <= 128 else _round_up(k, 16)
        p = jnp.pad(p, ((0, 0), (0, kp - k)))
        wm = jnp.pad(wm, ((0, kp - k), (0, COUT_PAD - cout)))
        patch_list.append(p.astype(jnp.bfloat16))
        wmat_list.append(wm.astype(jnp.bfloat16))
        kpads.append(kp)

    # M tiling: single block for small convs; 2-way "parallel" split for the
    # larger ones so v7x's two TensorCores can both work.
    if M > 256 and (M // 2) % 8 == 0:
        bm, grid_m = M // 2, 2
    else:
        bm, grid_m = M, 1

    args, in_specs = [], []
    for p, wm, kp in zip(patch_list, wmat_list, kpads):
        args += [p, wm]
        in_specs += [pl.BlockSpec((bm, kp), lambda m: (m, 0)),
                     pl.BlockSpec((kp, COUT_PAD), lambda m: (0, 0))]
    has_res = residual is not None
    if has_res:
        r = residual.reshape(M, cout).astype(jnp.float32)
        r = jnp.pad(r, ((0, 0), (0, COUT_PAD - cout)))
        args.append(r)
        in_specs.append(pl.BlockSpec((bm, COUT_PAD), lambda m: (m, 0)))

    kern = functools.partial(_fused_conv_kernel, n_inputs=len(inputs),
                             act=act, has_residual=has_res)
    y = pl.pallas_call(
        kern,
        out_shape=jax.ShapeDtypeStruct((M, COUT_PAD), jnp.float32),
        grid=(grid_m,),
        in_specs=in_specs,
        out_specs=pl.BlockSpec((bm, COUT_PAD), lambda m: (m, 0)),
        compiler_params=pltpu.CompilerParams(
            dimension_semantics=("parallel",)),
    )(*args)
    return y.reshape(N, Ho, Wo, COUT_PAD)[..., :cout]


def upsample2x(x_nhwc):
    # nearest-neighbor x2 == F.interpolate(scale_factor=2, mode="nearest")
    return jnp.repeat(jnp.repeat(x_nhwc, 2, axis=1), 2, axis=2)


# ----------------------------------------------------------------------------
# Deterministic synthetic parameters (shapes implied by the chosen enc/dec)
# ----------------------------------------------------------------------------
def init_params(key):
    def conv_p(k, cin, cout):
        kw_, kb_ = jax.random.split(k)
        return {"w": 0.1 * jax.random.normal(kw_, (3, 3, cin, cout), jnp.float32),
                "b": 0.01 * jax.random.normal(kb_, (cout,), jnp.float32)}
    ks = jax.random.split(key, 10)
    return {
        # encoder
        "econv1": conv_p(ks[0], 3, 16),    # stride 2
        "econv2": conv_p(ks[1], 16, 32),   # stride 2
        "rconv1": conv_p(ks[2], 32, 32),   # residual block
        "rconv2": conv_p(ks[3], 32, 32),
        # decoder
        "upconv2": conv_p(ks[4], 32, 16),
        "iconv2": conv_p(ks[5], 32, 16),   # after skip concat (16+16)
        "dispconv2": conv_p(ks[6], 16, 1),
        "upconv1": conv_p(ks[7], 16, 8),
        "iconv1": conv_p(ks[8], 8, 8),
        "dispconv1": conv_p(ks[9], 8, 1),
    }


# ----------------------------------------------------------------------------
# DispResNet forward:  encoder(x) -> decoder(features) -> disparities
# ----------------------------------------------------------------------------
def disp_resnet_forward(params, x_nchw, *, training=False):
    P = params
    x = jnp.transpose(x_nchw, (0, 2, 3, 1)).astype(jnp.float32)  # NCHW -> NHWC

    # ---- encoder (ResNet-style) ----
    f1 = conv3x3([(x, P["econv1"]["w"])], P["econv1"]["b"],
                 stride=2, act="relu")                            # (N, 8, 8, 16)
    p2 = conv3x3([(f1, P["econv2"]["w"])], P["econv2"]["b"],
                 stride=2, act="relu")                            # (N, 4, 4, 32)
    r = conv3x3([(p2, P["rconv1"]["w"])], P["rconv1"]["b"], act="relu")
    f2 = conv3x3([(r, P["rconv2"]["w"])], P["rconv2"]["b"],
                 act="relu", residual=p2)                         # (N, 4, 4, 32)
    # enc_features = [f1, f2]

    # ---- decoder (DispNet-style, multi-scale sigmoid disparity heads) ----
    u2 = conv3x3([(upsample2x(f2), P["upconv2"]["w"])], P["upconv2"]["b"],
                 act="relu")                                      # (N, 8, 8, 16)
    # skip connection: conv(concat([u2, f1])) as two accumulated matmuls
    w_i2 = P["iconv2"]["w"]
    i2 = conv3x3([(u2, w_i2[:, :, :16, :]), (f1, w_i2[:, :, 16:, :])],
                 P["iconv2"]["b"], act="relu")                    # (N, 8, 8, 16)
    disp2 = conv3x3([(i2, P["dispconv2"]["w"])], P["dispconv2"]["b"],
                    act="sigmoid")                                # (N, 8, 8, 1)

    u1 = conv3x3([(upsample2x(i2), P["upconv1"]["w"])], P["upconv1"]["b"],
                 act="relu")                                      # (N, 16, 16, 8)
    i1 = conv3x3([(u1, P["iconv1"]["w"])], P["iconv1"]["b"], act="relu")
    disp1 = conv3x3([(i1, P["dispconv1"]["w"])], P["dispconv1"]["b"],
                    act="sigmoid")                                # (N, 16, 16, 1)

    # back to NCHW, mirroring the PyTorch module's output convention
    outputs = tuple(jnp.transpose(d, (0, 3, 1, 2)) for d in (disp1, disp2))
    return outputs if training else outputs[0]   # eval: finest-scale disparity


if __name__ == "__main__":
    key = jax.random.PRNGKey(0)
    pkey, xkey = jax.random.split(key)
    params = init_params(pkey)
    x = jax.random.normal(xkey, (2, 3, 16, 16), jnp.float32)  # NCHW input
    fwd = jax.jit(functools.partial(disp_resnet_forward, training=False))
    disp = fwd(params, x)
    jax.block_until_ready(disp)
    assert disp.shape == (2, 1, 16, 16), disp.shape
    assert bool(jnp.all(jnp.isfinite(disp)))
    print("KERNEL_OK")
</pallas_src>

<mosaic_0001>
module attributes {stable_mosaic.version = 11 : i64} {
  func.func @_fused_conv_kernel(%arg0: i32, %arg1: memref<128x128xbf16, #tpu.memory_space<vmem>>, %arg2: memref<128x128xbf16, #tpu.memory_space<vmem>>, %arg3: memref<128x128xf32, #tpu.memory_space<vmem>>) attributes {dimension_semantics = [#tpu.dimension_semantics<parallel>], iteration_bounds = array<i64: 1>, scalar_prefetch = 0 : i64, scratch_operands = 0 : i64, tpu.core_type = #tpu.core_type<tc>, window_params = [{transform_indices = @transform_0, window_bounds = array<i64: 128, 128>}, {pipeline_mode = #tpu.pipeline_mode<synchronous>, transform_indices = @transform_1, window_bounds = array<i64: 128, 128>}, {transform_indices = @transform_2, window_bounds = array<i64: 128, 128>}]} {
    %c0 = arith.constant 0 : index
    %c0_0 = arith.constant 0 : index
    %0 = vector.load %arg1[%c0, %c0_0] : memref<128x128xbf16, #tpu.memory_space<vmem>>, vector<128x128xbf16>
    %c0_1 = arith.constant 0 : index
    %c0_2 = arith.constant 0 : index
    %1 = vector.load %arg2[%c0_1, %c0_2] : memref<128x128xbf16, #tpu.memory_space<vmem>>, vector<128x128xbf16>
    %cst = arith.constant dense<0.000000e+00> : vector<128x128xf32>
    %2 = tpu.matmul %0, %1, %cst {dimension_numbers = #tpu.dot_dimension_numbers<[1], [0], [0], [1], [0, 0, 1, 1], [], []>} : vector<128x128xbf16>, vector<128x128xbf16>, vector<128x128xf32> -> vector<128x128xf32>
    %cst_3 = arith.constant 0.000000e+00 : f32
    %3 = vector.broadcast %cst_3 : f32 to vector<128x128xf32>
    %4 = arith.maximumf %2, %3 : vector<128x128xf32>
    %c0_4 = arith.constant 0 : index
    %c0_5 = arith.constant 0 : index
    %5 = vector.load %arg3[%c0_4, %c0_5] : memref<128x128xf32, #tpu.memory_space<vmem>>, vector<128x128xf32>
    tpu.vector_store %arg3[%c0_4, %c0_5], %4 {strides = array<i32>} : memref<128x128xf32, #tpu.memory_space<vmem>>, vector<128x128xf32>,
    return
  }
  func.func @transform_0(%arg0: i32) -> (i32, i32) {
    %c0_i32 = arith.constant 0 : i32
    %c0_i32_0 = arith.constant 0 : i32
    return %arg0, %c0_i32 : i32, i32
  }
  func.func @transform_1(%arg0: i32) -> (i32, i32) {
    %c0_i32 = arith.constant 0 : i32
    %c0_i32_0 = arith.constant 0 : i32
    %c0_i32_1 = arith.constant 0 : i32
    return %c0_i32, %c0_i32_0 : i32, i32
  }
  func.func @transform_2(%arg0: i32) -> (i32, i32) {
    %c0_i32 = arith.constant 0 : i32
    %c0_i32_0 = arith.constant 0 : i32
    return %arg0, %c0_i32 : i32, i32
  }
}

module attributes {stable_mosaic.version = 11 : i64} {
  func.func @_fused_conv_kernel(%arg0: i32, %arg1: memref<32x160xbf16, #tpu.memory_space<vmem>>, %arg2: memref<160x128xbf16, #tpu.memory_space<vmem>>, %arg3: memref<32x128xf32, #tpu.memory_space<vmem>>) attributes {dimension_semantics = [#tpu.dimension_semantics<parallel>], iteration_bounds = array<i64: 1>, scalar_prefetch = 0 : i64, scratch_operands = 0 : i64, tpu.core_type = #tpu.core_type<tc>, window_params = [{transform_indices = @transform_0, window_bounds = array<i64: 32, 160>}, {pipeline_mode = #tpu.pipeline_mode<synchronous>, transform_indices = @transform_1, window_bounds = array<i64: 160, 128>}, {transform_indices = @transform_2, window_bounds = array<i64: 32, 128>}]} {
    %c0 = arith.constant 0 : index
    %c0_0 = arith.constant 0 : index
    %0 = vector.load %arg1[%c0, %c0_0] : memref<32x160xbf16, #tpu.memory_space<vmem>>, vector<32x160xbf16>
    %c0_1 = arith.constant 0 : index
    %c0_2 = arith.constant 0 : index
    %1 = vector.load %arg2[%c0_1, %c0_2] : memref<160x128xbf16, #tpu.memory_space<vmem>>, vector<160x128xbf16>
    %cst = arith.constant dense<0.000000e+00> : vector<32x128xf32>
    %2 = tpu.matmul %0, %1, %cst {dimension_numbers = #tpu.dot_dimension_numbers<[1], [0], [0], [1], [0, 0, 1, 1], [], []>} : vector<32x160xbf16>, vector<160x128xbf16>, vector<32x128xf32> -> vector<32x128xf32>
    %cst_3 = arith.constant 0.000000e+00 : f32
    %3 = vector.broadcast %cst_3 : f32 to vector<32x128xf32>
    %4 = arith.maximumf %2, %3 : vector<32x128xf32>
    %c0_4 = arith.constant 0 : index
    %c0_5 = arith.constant 0 : index
    %5 = vector.load %arg3[%c0_4, %c0_5] : memref<32x128xf32, #tpu.memory_space<vmem>>, vector<32x128xf32>
    tpu.vector_store %arg3[%c0_4, %c0_5], %4 {strides = array<i32>} : memref<32x128xf32, #tpu.memory_space<vmem>>, vector<32x128xf32>,
    return
  }
  func.func @transform_0(%arg0: i32) -> (i32, i32) {
    %c0_i32 = arith.constant 0 : i32
    %c0_i32_0 = arith.constant 0 : i32
    return %arg0, %c0_i32 : i32, i32
  }
  func.func @transform_1(%arg0: i32) -> (i32, i32) {
    %c0_i32 = arith.constant 0 : i32
    %c0_i32_0 = arith.constant 0 : i32
    %c0_i32_1 = arith.constant 0 : i32
    return %c0_i32, %c0_i32_0 : i32, i32
  }
  func.func @transform_2(%arg0: i32) -> (i32, i32) {
    %c0_i32 = arith.constant 0 : i32
    %c0_i32_0 = arith.constant 0 : i32
    return %arg0, %c0_i32 : i32, i32
  }
}

module attributes {stable_mosaic.version = 11 : i64} {
  func.func @_fused_conv_kernel(%arg0: i32, %arg1: memref<32x304xbf16, #tpu.memory_space<vmem>>, %arg2: memref<304x128xbf16, #tpu.memory_space<vmem>>, %arg3: memref<32x128xf32, #tpu.memory_space<vmem>>) attributes {dimension_semantics = [#tpu.dimension_semantics<parallel>], iteration_bounds = array<i64: 1>, scalar_prefetch = 0 : i64, scratch_operands = 0 : i64, tpu.core_type = #tpu.core_type<tc>, window_params = [{transform_indices = @transform_0, window_bounds = array<i64: 32, 304>}, {pipeline_mode = #tpu.pipeline_mode<synchronous>, transform_indices = @transform_1, window_bounds = array<i64: 304, 128>}, {transform_indices = @transform_2, window_bounds = array<i64: 32, 128>}]} {
    %c0 = arith.constant 0 : index
    %c0_0 = arith.constant 0 : index
    %0 = vector.load %arg1[%c0, %c0_0] : memref<32x304xbf16, #tpu.memory_space<vmem>>, vector<32x304xbf16>
    %c0_1 = arith.constant 0 : index
    %c0_2 = arith.constant 0 : index
    %1 = vector.load %arg2[%c0_1, %c0_2] : memref<304x128xbf16, #tpu.memory_space<vmem>>, vector<304x128xbf16>
    %cst = arith.constant dense<0.000000e+00> : vector<32x128xf32>
    %2 = tpu.matmul %0, %1, %cst {dimension_numbers = #tpu.dot_dimension_numbers<[1], [0], [0], [1], [0, 0, 1, 1], [], []>} : vector<32x304xbf16>, vector<304x128xbf16>, vector<32x128xf32> -> vector<32x128xf32>
    %cst_3 = arith.constant 0.000000e+00 : f32
    %3 = vector.broadcast %cst_3 : f32 to vector<32x128xf32>
    %4 = arith.maximumf %2, %3 : vector<32x128xf32>
    %c0_4 = arith.constant 0 : index
    %c0_5 = arith.constant 0 : index
    %5 = vector.load %arg3[%c0_4, %c0_5] : memref<32x128xf32, #tpu.memory_space<vmem>>, vector<32x128xf32>
    tpu.vector_store %arg3[%c0_4, %c0_5], %4 {strides = array<i32>} : memref<32x128xf32, #tpu.memory_space<vmem>>, vector<32x128xf32>,
    return
  }
  func.func @transform_0(%arg0: i32) -> (i32, i32) {
    %c0_i32 = arith.constant 0 : i32
    %c0_i32_0 = arith.constant 0 : i32
    return %arg0, %c0_i32 : i32, i32
  }
  func.func @transform_1(%arg0: i32) -> (i32, i32) {
    %c0_i32 = arith.constant 0 : i32
    %c0_i32_0 = arith.constant 0 : i32
    %c0_i32_1 = arith.constant 0 : i32
    return %c0_i32, %c0_i32_0 : i32, i32
  }
  func.func @transform_2(%arg0: i32) -> (i32, i32) {
    %c0_i32 = arith.constant 0 : i32
    %c0_i32_0 = arith.constant 0 : i32
    return %arg0, %c0_i32 : i32, i32
  }
}

module attributes {stable_mosaic.version = 11 : i64} {
  func.func @_fused_conv_kernel(%arg0: i32, %arg1: memref<32x304xbf16, #tpu.memory_space<vmem>>, %arg2: memref<304x128xbf16, #tpu.memory_space<vmem>>, %arg3: memref<32x128xf32, #tpu.memory_space<vmem>>, %arg4: memref<32x128xf32, #tpu.memory_space<vmem>>) attributes {dimension_semantics = [#tpu.dimension_semantics<parallel>], iteration_bounds = array<i64: 1>, scalar_prefetch = 0 : i64, scratch_operands = 0 : i64, tpu.core_type = #tpu.core_type<tc>, window_params = [{transform_indices = @transform_0, window_bounds = array<i64: 32, 304>}, {pipeline_mode = #tpu.pipeline_mode<synchronous>, transform_indices = @transform_1, window_bounds = array<i64: 304, 128>}, {transform_indices = @transform_2, window_bounds = array<i64: 32, 128>}, {transform_indices = @transform_3, window_bounds = array<i64: 32, 128>}]} {
    %c0 = arith.constant 0 : index
    %c0_0 = arith.constant 0 : index
    %0 = vector.load %arg1[%c0, %c0_0] : memref<32x304xbf16, #tpu.memory_space<vmem>>, vector<32x304xbf16>
    %c0_1 = arith.constant 0 : index
    %c0_2 = arith.constant 0 : index
    %1 = vector.load %arg2[%c0_1, %c0_2] : memref<304x128xbf16, #tpu.memory_space<vmem>>, vector<304x128xbf16>
    %cst = arith.constant dense<0.000000e+00> : vector<32x128xf32>
    %2 = tpu.matmul %0, %1, %cst {dimension_numbers = #tpu.dot_dimension_numbers<[1], [0], [0], [1], [0, 0, 1, 1], [], []>} : vector<32x304xbf16>, vector<304x128xbf16>, vector<32x128xf32> -> vector<32x128xf32>
    %c0_3 = arith.constant 0 : index
    %c0_4 = arith.constant 0 : index
    %3 = vector.load %arg3[%c0_3, %c0_4] : memref<32x128xf32, #tpu.memory_space<vmem>>, vector<32x128xf32>
    %4 = arith.addf %2, %3 : vector<32x128xf32>
    %cst_5 = arith.constant 0.000000e+00 : f32
    %5 = vector.broadcast %cst_5 : f32 to vector<32x128xf32>
    %6 = arith.maximumf %4, %5 : vector<32x128xf32>
    %c0_6 = arith.constant 0 : index
    %c0_7 = arith.constant 0 : index
    %7 = vector.load %arg4[%c0_6, %c0_7] : memref<32x128xf32, #tpu.memory_space<vmem>>, vector<32x128xf32>
    tpu.vector_store %arg4[%c0_6, %c0_7], %6 {strides = array<i32>} : memref<32x128xf32, #tpu.memory_space<vmem>>, vector<32x128xf32>,
    return
  }
  func.func @transform_0(%arg0: i32) -> (i32, i32) {
    %c0_i32 = arith.constant 0 : i32
    %c0_i32_0 = arith.constant 0 : i32
    return %arg0, %c0_i32 : i32, i32
  }
  func.func @transform_1(%arg0: i32) -> (i32, i32) {
    %c0_i32 = arith.constant 0 : i32
    %c0_i32_0 = arith.constant 0 : i32
    %c0_i32_1 = arith.constant 0 : i32
    return %c0_i32, %c0_i32_0 : i32, i32
  }
  func.func @transform_2(%arg0: i32) -> (i32, i32) {
    %c0_i32 = arith.constant 0 : i32
    %c0_i32_0 = arith.constant 0 : i32
    return %arg0, %c0_i32 : i32, i32
  }
  func.func @transform_3(%arg0: i32) -> (i32, i32) {
    %c0_i32 = arith.constant 0 : i32
    %c0_i32_0 = arith.constant 0 : i32
    return %arg0, %c0_i32 : i32, i32
  }
}

module attributes {stable_mosaic.version = 11 : i64} {
  func.func @_fused_conv_kernel(%arg0: i32, %arg1: memref<128x304xbf16, #tpu.memory_space<vmem>>, %arg2: memref<304x128xbf16, #tpu.memory_space<vmem>>, %arg3: memref<128x128xf32, #tpu.memory_space<vmem>>) attributes {dimension_semantics = [#tpu.dimension_semantics<parallel>], iteration_bounds = array<i64: 1>, scalar_prefetch = 0 : i64, scratch_operands = 0 : i64, tpu.core_type = #tpu.core_type<tc>, window_params = [{transform_indices = @transform_0, window_bounds = array<i64: 128, 304>}, {pipeline_mode = #tpu.pipeline_mode<synchronous>, transform_indices = @transform_1, window_bounds = array<i64: 304, 128>}, {transform_indices = @transform_2, window_bounds = array<i64: 128, 128>}]} {
    %c0 = arith.constant 0 : index
    %c0_0 = arith.constant 0 : index
    %0 = vector.load %arg1[%c0, %c0_0] : memref<128x304xbf16, #tpu.memory_space<vmem>>, vector<128x304xbf16>
    %c0_1 = arith.constant 0 : index
    %c0_2 = arith.constant 0 : index
    %1 = vector.load %arg2[%c0_1, %c0_2] : memref<304x128xbf16, #tpu.memory_space<vmem>>, vector<304x128xbf16>
    %cst = arith.constant dense<0.000000e+00> : vector<128x128xf32>
    %2 = tpu.matmul %0, %1, %cst {dimension_numbers = #tpu.dot_dimension_numbers<[1], [0], [0], [1], [0, 0, 1, 1], [], []>} : vector<128x304xbf16>, vector<304x128xbf16>, vector<128x128xf32> -> vector<128x128xf32>
    %cst_3 = arith.constant 0.000000e+00 : f32
    %3 = vector.broadcast %cst_3 : f32 to vector<128x128xf32>
    %4 = arith.maximumf %2, %3 : vector<128x128xf32>
    %c0_4 = arith.constant 0 : index
    %c0_5 = arith.constant 0 : index
    %5 = vector.load %arg3[%c0_4, %c0_5] : memref<128x128xf32, #tpu.memory_space<vmem>>, vector<128x128xf32>
    tpu.vector_store %arg3[%c0_4, %c0_5], %4 {strides = array<i32>} : memref<128x128xf32, #tpu.memory_space<vmem>>, vector<128x128xf32>,
    return
  }
  func.func @transform_0(%arg0: i32) -> (i32, i32) {
    %c0_i32 = arith.constant 0 : i32
    %c0_i32_0 = arith.constant 0 : i32
    return %arg0, %c0_i32 : i32, i32
  }
  func.func @transform_1(%arg0: i32) -> (i32, i32) {
    %c0_i32 = arith.constant 0 : i32
    %c0_i32_0 = arith.constant 0 : i32
    %c0_i32_1 = arith.constant 0 : i32
    return %c0_i32, %c0_i32_0 : i32, i32
  }
  func.func @transform_2(%arg0: i32) -> (i32, i32) {
    %c0_i32 = arith.constant 0 : i32
    %c0_i32_0 = arith.constant 0 : i32
    return %arg0, %c0_i32 : i32, i32
  }
}

module attributes {stable_mosaic.version = 11 : i64} {
  func.func @_fused_conv_kernel(%arg0: i32, %arg1: memref<128x160xbf16, #tpu.memory_space<vmem>>, %arg2: memref<160x128xbf16, #tpu.memory_space<vmem>>, %arg3: memref<128x144xbf16, #tpu.memory_space<vmem>>, %arg4: memref<144x128xbf16, #tpu.memory_space<vmem>>, %arg5: memref<128x128xf32, #tpu.memory_space<vmem>>) attributes {dimension_semantics = [#tpu.dimension_semantics<parallel>], iteration_bounds = array<i64: 1>, scalar_prefetch = 0 : i64, scratch_operands = 0 : i64, tpu.core_type = #tpu.core_type<tc>, window_params = [{transform_indices = @transform_0, window_bounds = array<i64: 128, 160>}, {pipeline_mode = #tpu.pipeline_mode<synchronous>, transform_indices = @transform_1, window_bounds = array<i64: 160, 128>}, {transform_indices = @transform_2, window_bounds = array<i64: 128, 144>}, {pipeline_mode = #tpu.pipeline_mode<synchronous>, transform_indices = @transform_3, window_bounds = array<i64: 144, 128>}, {transform_indices = @transform_4, window_bounds = array<i64: 128, 128>}]} {
    %c0 = arith.constant 0 : index
    %c0_0 = arith.constant 0 : index
    %0 = vector.load %arg1[%c0, %c0_0] : memref<128x160xbf16, #tpu.memory_space<vmem>>, vector<128x160xbf16>
    %c0_1 = arith.constant 0 : index
    %c0_2 = arith.constant 0 : index
    %1 = vector.load %arg2[%c0_1, %c0_2] : memref<160x128xbf16, #tpu.memory_space<vmem>>, vector<160x128xbf16>
    %cst = arith.constant dense<0.000000e+00> : vector<128x128xf32>
    %2 = tpu.matmul %0, %1, %cst {dimension_numbers = #tpu.dot_dimension_numbers<[1], [0], [0], [1], [0, 0, 1, 1], [], []>} : vector<128x160xbf16>, vector<160x128xbf16>, vector<128x128xf32> -> vector<128x128xf32>
    %c0_3 = arith.constant 0 : index
    %c0_4 = arith.constant 0 : index
    %3 = vector.load %arg3[%c0_3, %c0_4] : memref<128x144xbf16, #tpu.memory_space<vmem>>, vector<128x144xbf16>
    %c0_5 = arith.constant 0 : index
    %c0_6 = arith.constant 0 : index
    %4 = vector.load %arg4[%c0_5, %c0_6] : memref<144x128xbf16, #tpu.memory_space<vmem>>, vector<144x128xbf16>
    %cst_7 = arith.constant dense<0.000000e+00> : vector<128x128xf32>
    %5 = tpu.matmul %3, %4, %cst_7 {dimension_numbers = #tpu.dot_dimension_numbers<[1], [0], [0], [1], [0, 0, 1, 1], [], []>} : vector<128x144xbf16>, vector<144x128xbf16>, vector<128x128xf32> -> vector<128x128xf32>
    %6 = arith.addf %2, %5 : vector<128x128xf32>
    %cst_8 = arith.constant 0.000000e+00 : f32
    %7 = vector.broadcast %cst_8 : f32 to vector<128x128xf32>
    %8 = arith.maximumf %6, %7 : vector<128x128xf32>
    %c0_9 = arith.constant 0 : index
    %c0_10 = arith.constant 0 : index
    %9 = vector.load %arg5[%c0_9, %c0_10] : memref<128x128xf32, #tpu.memory_space<vmem>>, vector<128x128xf32>
    tpu.vector_store %arg5[%c0_9, %c0_10], %8 {strides = array<i32>} : memref<128x128xf32, #tpu.memory_space<vmem>>, vector<128x128xf32>,
    return
  }
  func.func @transform_0(%arg0: i32) -> (i32, i32) {
    %c0_i32 = arith.constant 0 : i32
    %c0_i32_0 = arith.constant 0 : i32
    return %arg0, %c0_i32 : i32, i32
  }
  func.func @transform_1(%arg0: i32) -> (i32, i32) {
    %c0_i32 = arith.constant 0 : i32
    %c0_i32_0 = arith.constant 0 : i32
    %c0_i32_1 = arith.constant 0 : i32
    return %c0_i32, %c0_i32_0 : i32, i32
  }
  func.func @transform_2(%arg0: i32) -> (i32, i32) {
    %c0_i32 = arith.constant 0 : i32
    %c0_i32_0 = arith.constant 0 : i32
    return %arg0, %c0_i32 : i32, i32
  }
  func.func @transform_3(%arg0: i32) -> (i32, i32) {
    %c0_i32 = arith.constant 0 : i32
    %c0_i32_0 = arith.constant 0 : i32
    %c0_i32_1 = arith.constant 0 : i32
    return %c0_i32, %c0_i32_0 : i32, i32
  }
  func.func @transform_4(%arg0: i32) -> (i32, i32) {
    %c0_i32 = arith.constant 0 : i32
    %c0_i32_0 = arith.constant 0 : i32
    return %arg0, %c0_i32 : i32, i32
  }
}

module attributes {stable_mosaic.version = 11 : i64} {
  func.func @_fused_conv_kernel(%arg0: i32, %arg1: memref<256x160xbf16, #tpu.memory_space<vmem>>, %arg2: memref<160x128xbf16, #tpu.memory_space<vmem>>, %arg3: memref<256x128xf32, #tpu.memory_space<vmem>>) attributes {dimension_semantics = [#tpu.dimension_semantics<parallel>], iteration_bounds = array<i64: 2>, scalar_prefetch = 0 : i64, scratch_operands = 0 : i64, tpu.core_type = #tpu.core_type<tc>, window_params = [{transform_indices = @transform_0, window_bounds = array<i64: 256, 160>}, {pipeline_mode = #tpu.pipeline_mode<synchronous>, transform_indices = @transform_1, window_bounds = array<i64: 160, 128>}, {transform_indices = @transform_2, window_bounds = array<i64: 256, 128>}]} {
    %c0 = arith.constant 0 : index
    %c0_0 = arith.constant 0 : index
    %0 = vector.load %arg1[%c0, %c0_0] : memref<256x160xbf16, #tpu.memory_space<vmem>>, vector<256x160xbf16>
    %c0_1 = arith.constant 0 : index
    %c0_2 = arith.constant 0 : index
    %1 = vector.load %arg2[%c0_1, %c0_2] : memref<160x128xbf16, #tpu.memory_space<vmem>>, vector<160x128xbf16>
    %cst = arith.constant dense<0.000000e+00> : vector<256x128xf32>
    %2 = tpu.matmul %0, %1, %cst {dimension_numbers = #tpu.dot_dimension_numbers<[1], [0], [0], [1], [0, 0, 1, 1], [], []>} : vector<256x160xbf16>, vector<160x128xbf16>, vector<256x128xf32> -> vector<256x128xf32>
    %cst_3 = arith.constant 0.000000e+00 : f32
    %3 = vector.broadcast %cst_3 : f32 to vector<256x128xf32>
    %4 = arith.maximumf %2, %3 : vector<256x128xf32>
    %c0_4 = arith.constant 0 : index
    %c0_5 = arith.constant 0 : index
    %5 = vector.load %arg3[%c0_4, %c0_5] : memref<256x128xf32, #tpu.memory_space<vmem>>, vector<256x128xf32>
    tpu.vector_store %arg3[%c0_4, %c0_5], %4 {strides = array<i32>} : memref<256x128xf32, #tpu.memory_space<vmem>>, vector<256x128xf32>,
    return
  }
  func.func @transform_0(%arg0: i32) -> (i32, i32) {
    %c0_i32 = arith.constant 0 : i32
    %c0_i32_0 = arith.constant 0 : i32
    return %arg0, %c0_i32 : i32, i32
  }
  func.func @transform_1(%arg0: i32) -> (i32, i32) {
    %c0_i32 = arith.constant 0 : i32
    %c0_i32_0 = arith.constant 0 : i32
    %c0_i32_1 = arith.constant 0 : i32
    return %c0_i32, %c0_i32_0 : i32, i32
  }
  func.func @transform_2(%arg0: i32) -> (i32, i32) {
    %c0_i32 = arith.constant 0 : i32
    %c0_i32_0 = arith.constant 0 : i32
    return %arg0, %c0_i32 : i32, i32
  }
}

module attributes {stable_mosaic.version = 11 : i64} {
  func.func @_fused_conv_kernel(%arg0: i32, %arg1: memref<256x128xbf16, #tpu.memory_space<vmem>>, %arg2: memref<128x128xbf16, #tpu.memory_space<vmem>>, %arg3: memref<256x128xf32, #tpu.memory_space<vmem>>) attributes {dimension_semantics = [#tpu.dimension_semantics<parallel>], iteration_bounds = array<i64: 2>, scalar_prefetch = 0 : i64, scratch_operands = 0 : i64, tpu.core_type = #tpu.core_type<tc>, window_params = [{transform_indices = @transform_0, window_bounds = array<i64: 256, 128>}, {pipeline_mode = #tpu.pipeline_mode<synchronous>, transform_indices = @transform_1, window_bounds = array<i64: 128, 128>}, {transform_indices = @transform_2, window_bounds = array<i64: 256, 128>}]} {
    %c0 = arith.constant 0 : index
    %c0_0 = arith.constant 0 : index
    %0 = vector.load %arg1[%c0, %c0_0] : memref<256x128xbf16, #tpu.memory_space<vmem>>, vector<256x128xbf16>
    %c0_1 = arith.constant 0 : index
    %c0_2 = arith.constant 0 : index
    %1 = vector.load %arg2[%c0_1, %c0_2] : memref<128x128xbf16, #tpu.memory_space<vmem>>, vector<128x128xbf16>
    %cst = arith.constant dense<0.000000e+00> : vector<256x128xf32>
    %2 = tpu.matmul %0, %1, %cst {dimension_numbers = #tpu.dot_dimension_numbers<[1], [0], [0], [1], [0, 0, 1, 1], [], []>} : vector<256x128xbf16>, vector<128x128xbf16>, vector<256x128xf32> -> vector<256x128xf32>
    %cst_3 = arith.constant 0.000000e+00 : f32
    %3 = vector.broadcast %cst_3 : f32 to vector<256x128xf32>
    %4 = arith.maximumf %2, %3 : vector<256x128xf32>
    %c0_4 = arith.constant 0 : index
    %c0_5 = arith.constant 0 : index
    %5 = vector.load %arg3[%c0_4, %c0_5] : memref<256x128xf32, #tpu.memory_space<vmem>>, vector<256x128xf32>
    tpu.vector_store %arg3[%c0_4, %c0_5], %4 {strides = array<i32>} : memref<256x128xf32, #tpu.memory_space<vmem>>, vector<256x128xf32>,
    return
  }
  func.func @transform_0(%arg0: i32) -> (i32, i32) {
    %c0_i32 = arith.constant 0 : i32
    %c0_i32_0 = arith.constant 0 : i32
    return %arg0, %c0_i32 : i32, i32
  }
  func.func @transform_1(%arg0: i32) -> (i32, i32) {
    %c0_i32 = arith.constant 0 : i32
    %c0_i32_0 = arith.constant 0 : i32
    %c0_i32_1 = arith.constant 0 : i32
    return %c0_i32, %c0_i32_0 : i32, i32
  }
  func.func @transform_2(%arg0: i32) -> (i32, i32) {
    %c0_i32 = arith.constant 0 : i32
    %c0_i32_0 = arith.constant 0 : i32
    return %arg0, %c0_i32 : i32, i32
  }
}

module attributes {stable_mosaic.version = 11 : i64} {
  func.func @_fused_conv_kernel(%arg0: i32, %arg1: memref<256x128xbf16, #tpu.memory_space<vmem>>, %arg2: memref<128x128xbf16, #tpu.memory_space<vmem>>, %arg3: memref<256x128xf32, #tpu.memory_space<vmem>>) attributes {dimension_semantics = [#tpu.dimension_semantics<parallel>], iteration_bounds = array<i64: 2>, scalar_prefetch = 0 : i64, scratch_operands = 0 : i64, tpu.core_type = #tpu.core_type<tc>, window_params = [{transform_indices = @transform_0, window_bounds = array<i64: 256, 128>}, {pipeline_mode = #tpu.pipeline_mode<synchronous>, transform_indices = @transform_1, window_bounds = array<i64: 128, 128>}, {transform_indices = @transform_2, window_bounds = array<i64: 256, 128>}]} {
    %c0 = arith.constant 0 : index
    %c0_0 = arith.constant 0 : index
    %0 = vector.load %arg1[%c0, %c0_0] : memref<256x128xbf16, #tpu.memory_space<vmem>>, vector<256x128xbf16>
    %c0_1 = arith.constant 0 : index
    %c0_2 = arith.constant 0 : index
    %1 = vector.load %arg2[%c0_1, %c0_2] : memref<128x128xbf16, #tpu.memory_space<vmem>>, vector<128x128xbf16>
    %cst = arith.constant dense<0.000000e+00> : vector<256x128xf32>
    %2 = tpu.matmul %0, %1, %cst {dimension_numbers = #tpu.dot_dimension_numbers<[1], [0], [0], [1], [0, 0, 1, 1], [], []>} : vector<256x128xbf16>, vector<128x128xbf16>, vector<256x128xf32> -> vector<256x128xf32>
    %3 = arith.negf %2 : vector<256x128xf32>
    %4 = math.exp %3 : vector<256x128xf32>
    %cst_3 = arith.constant 1.000000e+00 : f32
    %5 = vector.broadcast %cst_3 : f32 to vector<256x128xf32>
    %6 = arith.addf %5, %4 : vector<256x128xf32>
    %7 = arith.divf %5, %6 : vector<256x128xf32>
    %c0_4 = arith.constant 0 : index
    %c0_5 = arith.constant 0 : index
    %8 = vector.load %arg3[%c0_4, %c0_5] : memref<256x128xf32, #tpu.memory_space<vmem>>, vector<256x128xf32>
    tpu.vector_store %arg3[%c0_4, %c0_5], %7 {strides = array<i32>} : memref<256x128xf32, #tpu.memory_space<vmem>>, vector<256x128xf32>,
    return
  }
  func.func @transform_0(%arg0: i32) -> (i32, i32) {
    %c0_i32 = arith.constant 0 : i32
    %c0_i32_0 = arith.constant 0 : i32
    return %arg0, %c0_i32 : i32, i32
  }
  func.func @transform_1(%arg0: i32) -> (i32, i32) {
    %c0_i32 = arith.constant 0 : i32
    %c0_i32_0 = arith.constant 0 : i32
    %c0_i32_1 = arith.constant 0 : i32
    return %c0_i32, %c0_i32_0 : i32, i32
  }
  func.func @transform_2(%arg0: i32) -> (i32, i32) {
    %c0_i32 = arith.constant 0 : i32
    %c0_i32_0 = arith.constant 0 : i32
    return %arg0, %c0_i32 : i32, i32
  }
}

</mosaic_0001>

<bundles_post_ra>
// kernel: disp_resnet_forward.9
= control target key start
LH: loop header
LB: loop body
LE: loop exit
PB: predicated region body
PF: predicated region fallthrough
CT: control target
= control target key end

     0   :  { %s480_s1 = inlined_call_operand.vmem [shape: bf16[128,128], index: 1, kind: input, shape index: {}]   ;;  %s481_s0 = inlined_call_operand.vmem [shape: bf16[128,128], index: 0, kind: input, shape index: {}]   ;;  %s482_s2 = inlined_call_operand.vmem [shape: f32[128,128], index: 2, kind: output, shape index: {}]  }
   0x1   :  { %v353_v0 = vld [vmem:[%s480_s1] sm:$0xff]   ;;  %v354_v1 = vld [vmem:[%s480_s1 + $0x8] sm:$0xff]   ;;  %v355_v2 = vld [vmem:[%s480_s1 + $0x10] sm:$0xff]  }
   0x2   :  { %305 = vmatprep.subr.bf16.mxu0 %v353_v0  ;;  %337 = vmatprep.subr.bf16.mxu1 %v353_v0  ;;  %v356_v3 = vld [vmem:[%s480_s1 + $0x18] sm:$0xff]   ;;  %v361_v4 = vld [vmem:[%s481_s0] sm:$0xff]   ;;  %v358_v7 = vld [vmem:[%s480_s1 + $0x28] sm:$0xff]  }
   0x3   :  { %306 = vmatpush3.bf16.msra.mxu0 %v353_v0  ;;  %345 = vmatpush3.bf16.msra.mxu1 %v353_v0  ;;  %v362_v5 = vld [vmem:[%s481_s0 + $0x20] sm:$0xff]   ;;  %v359_v8 = vld [vmem:[%s480_s1 + $0x30] sm:$0xff]   ;;  %v360_v9 = vld [vmem:[%s480_s1 + $0x38] sm:$0xff]  }
   0x4   :  { %307 = vmatprep.subr.bf16.mxu0 %v354_v1  ;;  %338 = vmatprep.subr.bf16.mxu1 %v354_v1  ;;  %v357_v6 = vld [vmem:[%s480_s1 + $0x20] sm:$0xff]   ;;  %v363_v10 = vld [vmem:[%s481_s0 + $0x8] sm:$0xff]   ;;  %v365_v12 = vld [vmem:[%s481_s0 + $0x10] sm:$0xff]  }
   0x5   :  { %321 = vmatprep.mubr.bf16.mxu0 %v361_v4  ;;  %329 = vmatprep.mubr.bf16.mxu1 %v362_v5  ;;  %v364_v11 = vld [vmem:[%s481_s0 + $0x28] sm:$0xff]   ;;  %v366_v13 = vld [vmem:[%s481_s0 + $0x30] sm:$0xff]   ;;  %v367_v14 = vld [vmem:[%s481_s0 + $0x18] sm:$0xff]  }
   0x6   :  { %v368_v15 = vld [vmem:[%s481_s0 + $0x38] sm:$0xff]  }
   0x7   :  { %308 = vmatpush3.bf16.msra.mxu0 %v354_v1  ;;  %346 = vmatpush3.bf16.msra.mxu1 %v354_v1 }
   0x8   :  { %309 = vmatprep.subr.bf16.mxu0 %v355_v2  ;;  %339 = vmatprep.subr.bf16.mxu1 %v355_v2 }
   0xb   :  { %310 = vmatpush3.bf16.msra.mxu0 %v355_v2  ;;  %347 = vmatpush3.bf16.msra.mxu1 %v355_v2 }
   0xc   :  { %311 = vmatprep.subr.bf16.mxu0 %v356_v3  ;;  %340 = vmatprep.subr.bf16.mxu1 %v356_v3 }
   0xf   :  { %312 = vmatpush3.bf16.msra.mxu0 %v356_v3  ;;  %348 = vmatpush3.bf16.msra.mxu1 %v356_v3 }
  0x10   :  { %313 = vmatprep.subr.bf16.mxu0 %v357_v6  ;;  %341 = vmatprep.subr.bf16.mxu1 %v357_v6 }
  0x13   :  { %314 = vmatpush3.bf16.msra.mxu0 %v357_v6  ;;  %349 = vmatpush3.bf16.msra.mxu1 %v357_v6 }
  0x14   :  { %315 = vmatprep.subr.bf16.mxu0 %v358_v7  ;;  %342 = vmatprep.subr.bf16.mxu1 %v358_v7 }
  0x17   :  { %316 = vmatpush3.bf16.msra.mxu0 %v358_v7  ;;  %350 = vmatpush3.bf16.msra.mxu1 %v358_v7 }
  0x18   :  { %317 = vmatprep.subr.bf16.mxu0 %v359_v8  ;;  %343 = vmatprep.subr.bf16.mxu1 %v359_v8 }
  0x1b   :  { %318 = vmatpush3.bf16.msra.mxu0 %v359_v8  ;;  %351 = vmatpush3.bf16.msra.mxu1 %v359_v8 }
  0x1c   :  { %319 = vmatprep.subr.bf16.mxu0 %v360_v9  ;;  %344 = vmatprep.subr.bf16.mxu1 %v360_v9 }
  0x1f   :  { %320 = vmatpush3.bf16.msra.mxu0 %v360_v9  ;;  %352 = vmatpush3.bf16.msra.mxu1 %v360_v9 }
  0x22   :  { %322 = vmatmul.mubr.bf16.vlgmr.msra.gmra.mrb[0].mxu0 %v363_v10  ;;  %330 = vmatmul.mubr.bf16.vlgmr.msra.gmra.mrb[0].mxu1 %v364_v11 }
  0x23   :  { %325 = vmatprep.mubr.bf16.mxu0 %v365_v12  ;;  %333 = vmatprep.mubr.bf16.mxu1 %v366_v13 }
  0x2a   :  { %326 = vmatmul.mubr.bf16.gmra.mrb[4].mxu0 %v367_v14  ;;  %334 = vmatmul.mubr.bf16.gmra.mrb[4].mxu1 %v368_v15 }
  0xf5   :  { %v323_v16 = vpop.f32.mrb[0].mxu0  ;;  %v331_v17 = vpop.f32.mrb[0].mxu1 }
  0xf6   :  { %v239_v18 = vmax.f32 %v323_v16, 0.0  ;;  %v247_v19 = vmax.f32 %v331_v17, 0.0  ;;  %v174_v20 = vpop.f32.mrb[1].mxu0  ;;  %v206_v21 = vpop.f32.mrb[1].mxu1 }
  0xf7   :  { %v237_v22 = vmax.f32 %v174_v20, 0.0  ;;  %v245_v23 = vmax.f32 %v206_v21, 0.0  ;;  %v324_v24 = vpop.f32.mrb[2].mxu0  ;;  %v332_v25 = vpop.f32.mrb[2].mxu1 }
  0xf8   :  { %255 = vst [vmem:[%s482_s2 + $0x10] sm:$0xff] %v239_v18  ;;  %263 = vst [vmem:[%s482_s2 + $0x50] sm:$0xff] %v247_v19  ;;  %v240_v26 = vmax.f32 %v324_v24, 0.0  ;;  %v248_v27 = vmax.f32 %v332_v25, 0.0  ;;  %v177_v28 = vpop.f32.mrb[3].mxu0  ;;  %v209_v29 = vpop.f32.mrb[3].mxu1 }
  0xf9   :  { %253 = vst [vmem:[%s482_s2] sm:$0xff] %v237_v22  ;;  %261 = vst [vmem:[%s482_s2 + $0x40] sm:$0xff] %v245_v23  ;;  %v238_v30 = vmax.f32 %v177_v28, 0.0  ;;  %v246_v31 = vmax.f32 %v209_v29, 0.0 }
  0xfa   :  { %256 = vst [vmem:[%s482_s2 + $0x18] sm:$0xff] %v240_v26  ;;  %264 = vst [vmem:[%s482_s2 + $0x58] sm:$0xff] %v248_v27 }
  0xfb   :  { %254 = vst [vmem:[%s482_s2 + $0x8] sm:$0xff] %v238_v30  ;;  %262 = vst [vmem:[%s482_s2 + $0x48] sm:$0xff] %v246_v31 }
  0xfd   :  { %v327_v32 = vpop.f32.mrb[4].mxu0  ;;  %v335_v33 = vpop.f32.mrb[4].mxu1 }
  0xfe   :  { %v243_v34 = vmax.f32 %v327_v32, 0.0  ;;  %v251_v35 = vmax.f32 %v335_v33, 0.0  ;;  %v190_v36 = vpop.f32.mrb[5].mxu0  ;;  %v222_v37 = vpop.f32.mrb[5].mxu1 }
  0xff   :  { %v241_v38 = vmax.f32 %v190_v36, 0.0  ;;  %v249_v39 = vmax.f32 %v222_v37, 0.0  ;;  %v328_v40 = vpop.f32.mrb[6].mxu0  ;;  %v336_v41 = vpop.f32.mrb[6].mxu1 }
 0x100   :  { %259 = vst [vmem:[%s482_s2 + $0x30] sm:$0xff] %v243_v34  ;;  %267 = vst [vmem:[%s482_s2 + $0x70] sm:$0xff] %v251_v35  ;;  %v244_v42 = vmax.f32 %v328_v40, 0.0  ;;  %v252_v43 = vmax.f32 %v336_v41, 0.0  ;;  %v193_v44 = vpop.f32.mrb[7].mxu0  ;;  %v225_v45 = vpop.f32.mrb[7].mxu1 }
 0x101   :  { %257 = vst [vmem:[%s482_s2 + $0x20] sm:$0xff] %v241_v38  ;;  %265 = vst [vmem:[%s482_s2 + $0x60] sm:$0xff] %v249_v39  ;;  %v242_v46 = vmax.f32 %v193_v44, 0.0  ;;  %v250_v47 = vmax.f32 %v225_v45, 0.0 }
 0x102   :  { %260 = vst [vmem:[%s482_s2 + $0x38] sm:$0xff] %v244_v42  ;;  %268 = vst [vmem:[%s482_s2 + $0x78] sm:$0xff] %v252_v43 }
 0x103   :  { %258 = vst [vmem:[%s482_s2 + $0x28] sm:$0xff] %v242_v46  ;;  %266 = vst [vmem:[%s482_s2 + $0x68] sm:$0xff] %v250_v47 }

// kernel: disp_resnet_forward.10
= control target key start
LH: loop header
LB: loop body
LE: loop exit
PB: predicated region body
PF: predicated region fallthrough
CT: control target
= control target key end

     0   :  { %v235_v0 = vmov 0   ;;  %vm114_vm0 = vcmask 261120   ;;  %s305_s1 = inlined_call_operand.vmem [shape: bf16[160,128], index: 1, kind: input, shape index: {}]   ;;  %s306_s0 = inlined_call_operand.vmem [shape: bf16[32,160], index: 0, kind: input, shape index: {}]   ;;  %s307_s2 = inlined_call_operand.vmem [shape: f32[32,128], index: 2, kind: output, shape index: {}]  }
   0x1   :  { %121 = vmatprep.subr.bf16.mxu0 %v235_v0  ;;  %198 = vmatprep.subr.bf16.mxu1 %v235_v0  ;;  %v219_v1 = vld [vmem:[%s305_s1] sm:$0xff]   ;;  %v220_v2 = vld [vmem:[%s305_s1 + $0x8] sm:$0xff]   ;;  %v221_v3 = vld [vmem:[%s305_s1 + $0x10] sm:$0xff]  }
   0x2   :  { %122 = vmatpush1.bf16.msra.mxu0 %v219_v1  ;;  %208 = vmatpush1.bf16.msra.mxu1 %v219_v1  ;;  %v222_v4 = vld [vmem:[%s305_s1 + $0x18] sm:$0xff]   ;;  %v231_v5 = vld [vmem:[%s306_s0 + $0x4] ss:$8 sps:$4 sm:$0xff]   ;;  %v225_v9 = vld [vmem:[%s305_s1 + $0x30] sm:$0xff]  }
   0x3   :  { %123 = vmatprep.subr.bf16.mxu0 %v235_v0  ;;  %199 = vmatprep.subr.bf16.mxu1 %v235_v0  ;;  %v234_v6 = vld [vmem:[%s306_s0 + $0x14] ss:$8 sps:$4 sm:$0xff]   ;;  %v223_v7 = vld [vmem:[%s305_s1 + $0x20] sm:$0xff]   ;;  %v224_v8 = vld [vmem:[%s305_s1 + $0x28] sm:$0xff]  }
   0x4   :  { %196 = vmatprep.mubr.msk.bf16.mxu0 %vm114_vm0, %v231_v5  ;;  %197 = vmatprep.mubr.msk.bf16.mxu1 %vm114_vm0, %v234_v6  ;;  %v226_v10 = vld [vmem:[%s305_s1 + $0x38] sm:$0xff]   ;;  %v227_v11 = vld [vmem:[%s305_s1 + $0x40] sm:$0xff]   ;;  %v228_v12 = vld [vmem:[%s305_s1 + $0x48] sm:$0xff]  }
   0x5   :  { %v229_v13 = vld [vmem:[%s306_s0] ss:$8 sps:$4 sm:$0xff]   ;;  %v232_v14 = vld [vmem:[%s306_s0 + $0x10] ss:$8 sps:$4 sm:$0xff]  }
   0x6   :  { %124 = vmatpush1.bf16.msra.mxu0 %v220_v2  ;;  %209 = vmatpush1.bf16.msra.mxu1 %v220_v2 }
   0x7   :  { %125 = vmatprep.subr.bf16.mxu0 %v235_v0  ;;  %200 = vmatprep.subr.bf16.mxu1 %v235_v0 }
   0xa   :  { %126 = vmatpush1.bf16.msra.mxu0 %v221_v3  ;;  %210 = vmatpush1.bf16.msra.mxu1 %v221_v3 }
   0xb   :  { %127 = vmatprep.subr.bf16.mxu0 %v235_v0  ;;  %201 = vmatprep.subr.bf16.mxu1 %v235_v0 }
   0xe   :  { %128 = vmatpush1.bf16.msra.mxu0 %v222_v4  ;;  %211 = vmatpush1.bf16.msra.mxu1 %v222_v4 }
   0xf   :  { %129 = vmatprep.subr.bf16.mxu0 %v235_v0  ;;  %202 = vmatprep.subr.bf16.mxu1 %v235_v0 }
  0x12   :  { %130 = vmatpush1.bf16.msra.mxu0 %v223_v7  ;;  %212 = vmatpush1.bf16.msra.mxu1 %v223_v7 }
  0x13   :  { %131 = vmatprep.subr.bf16.mxu0 %v235_v0  ;;  %203 = vmatprep.subr.bf16.mxu1 %v235_v0 }
  0x16   :  { %132 = vmatpush1.bf16.msra.mxu0 %v224_v8  ;;  %213 = vmatpush1.bf16.msra.mxu1 %v224_v8 }
  0x17   :  { %133 = vmatprep.subr.bf16.mxu0 %v235_v0  ;;  %204 = vmatprep.subr.bf16.mxu1 %v235_v0 }
  0x1a   :  { %134 = vmatpush1.bf16.msra.mxu0 %v225_v9  ;;  %214 = vmatpush1.bf16.msra.mxu1 %v225_v9 }
  0x1b   :  { %135 = vmatprep.subr.bf16.mxu0 %v235_v0  ;;  %205 = vmatprep.subr.bf16.mxu1 %v235_v0 }
  0x1e   :  { %136 = vmatpush1.bf16.msra.mxu0 %v226_v10  ;;  %215 = vmatpush1.bf16.msra.mxu1 %v226_v10 }
  0x1f   :  { %137 = vmatprep.subr.bf16.mxu0 %v235_v0  ;;  %206 = vmatprep.subr.bf16.mxu1 %v235_v0 }
  0x22   :  { %138 = vmatpush1.bf16.msra.mxu0 %v227_v11  ;;  %216 = vmatpush1.bf16.msra.mxu1 %v227_v11 }
  0x23   :  { %139 = vmatprep.subr.bf16.mxu0 %v235_v0  ;;  %207 = vmatprep.subr.bf16.mxu1 %v235_v0 }
  0x26   :  { %140 = vmatpush1.bf16.msra.mxu0 %v228_v12  ;;  %217 = vmatpush1.bf16.msra.mxu1 %v228_v12 }
  0x29   :  { %154 = vmatmul.mubr.bf16.vlgmr.msra.gmra.mrb[0].mxu0 %v229_v13  ;;  %162 = vmatmul.mubr.bf16.vlgmr.msra.gmra.mrb[0].mxu1 %v232_v14 }
  0xfc   :  { %v155_v15 = vpop.f32.mrb[0].mxu0  ;;  %v163_v16 = vpop.f32.mrb[0].mxu1 }
  0xfd   :  { %v170_v17 = vmax.f32 %v155_v15, 0.0  ;;  %v172_v18 = vmax.f32 %v163_v16, 0.0  ;;  %v157_v19 = vpop.f32.mrb[1].mxu0  ;;  %v165_v20 = vpop.f32.mrb[1].mxu1 }
  0xfe   :  { %v158_v21 = vpop.f32.mrb[2].mxu0  ;;  %v166_v22 = vpop.f32.mrb[2].mxu1 }
  0xff   :  { %174 = vst [vmem:[%s307_s2] sm:$0xff] %v170_v17  ;;  %176 = vst [vmem:[%s307_s2 + $0x10] sm:$0xff] %v172_v18  ;;  %v171_v23 = vmax.f32 %v158_v21, 0.0  ;;  %v173_v24 = vmax.f32 %v166_v22, 0.0  ;;  %v160_v25 = vpop.f32.mrb[3].mxu0  ;;  %v168_v26 = vpop.f32.mrb[3].mxu1 }
 0x101   :  { %175 = vst [vmem:[%s307_s2 + $0x8] sm:$0xff] %v171_v23  ;;  %177 = vst [vmem:[%s307_s2 + $0x18] sm:$0xff] %v173_v24 }

// kernel: disp_resnet_forward.11
= control target key start
LH: loop header
LB: loop body
LE: loop exit
PB: predicated region body
PF: predicated region fallthrough
CT: control target
= control target key end

     0   :  { %vm202_vm0 = vcmask 392192   ;;  %s518_s1 = inlined_call_operand.vmem [shape: bf16[304,128], index: 1, kind: input, shape index: {}]   ;;  %s519_s0 = inlined_call_operand.vmem [shape: bf16[32,304], index: 0, kind: input, shape index: {}]   ;;  %s520_s2 = inlined_call_operand.vmem [shape: f32[32,128], index: 2, kind: output, shape index: {}]  }
   0x1   :  { %v389_v0 = vld [vmem:[%s518_s1 + $0x40] sm:$0xff]   ;;  %v391_v2 = vld [vmem:[%s518_s1 + $0x48] sm:$0xff]   ;;  %v393_v4 = vld [vmem:[%s518_s1 + $0x50] sm:$0xff]  }
   0x2   :  { %v390_v1 = vld [vmem:[%s518_s1] sm:$0xff]   ;;  %346 = vmatprep.subr.bf16.mxu0 %v389_v0  ;;  %v392_v3 = vld [vmem:[%s518_s1 + $0x8] sm:$0xff]   ;;  %v394_v5 = vld [vmem:[%s518_s1 + $0x10] sm:$0xff]  }
   0x3   :  { %347 = vmatpush3.bf16.msra.mxu0 %v390_v1  ;;  %v395_v6 = vld [vmem:[%s518_s1 + $0x58] sm:$0xff]   ;;  %v397_v8 = vld [vmem:[%s518_s1 + $0x60] sm:$0xff]   ;;  %v404_v11 = vld [vmem:[%s518_s1 + $0x88] sm:$0xff]  }
   0x4   :  { %348 = vmatprep.subr.bf16.mxu0 %v391_v2  ;;  %v396_v7 = vld [vmem:[%s518_s1 + $0x18] sm:$0xff]   ;;  %v401_v9 = vld [vmem:[%s518_s1 + $0x80] sm:$0xff]   ;;  %v399_v12 = vld [vmem:[%s518_s1 + $0x68] sm:$0xff]  }
   0x5   :  { %v398_v10 = vld [vmem:[%s518_s1 + $0x20] sm:$0xff]   ;;  %379 = vmatprep.subr.bf16.mxu1 %v401_v9  ;;  %v400_v13 = vld [vmem:[%s518_s1 + $0x28] sm:$0xff]   ;;  %v407_v14 = vld [vmem:[%s518_s1 + $0x90] sm:$0xff]  }
   0x6   :  { %380 = vmatpush3.bf16.msra.mxu1 %v401_v9  ;;  %v402_v15 = vld [vmem:[%s518_s1 + $0x70] sm:$0xff]   ;;  %v412_v18 = vld [vmem:[%s519_s0 + $0x20] ss:$12 sps:$4 sm:$0xff]   ;;  %v405_v20 = vld [vmem:[%s518_s1 + $0x78] sm:$0xff]  }
   0x7   :  { %349 = vmatpush3.bf16.msra.mxu0 %v392_v3  ;;  %381 = vmatprep.subr.bf16.mxu1 %v404_v11  ;;  %v410_v16 = vld [vmem:[%s519_s0 + $0x4] ss:$12 sps:$4 sm:$0xff]   ;;  %v411_v17 = vld [vmem:[%s519_s0 + $0x8] ss:$12 sps:$4 sm:$0xff]   ;;  %v406_v21 = vld [vmem:[%s518_s1 + $0x38] sm:$0xff]  }
   0x8   :  { %350 = vmatprep.subr.bf16.mxu0 %v393_v4  ;;  %241 = vmatprep.mubr.bf16.mxu0 %v410_v16  ;;  %v403_v19 = vld [vmem:[%s518_s1 + $0x30] sm:$0xff]   ;;  %v408_v22 = vld [vmem:[%s519_s0] ss:$12 sps:$4 sm:$0xff]   ;;  %v413_v23 = vld [vmem:[%s519_s0 + $0x1c] ss:$12 sps:$4 sm:$0xff]  }
   0x9   :  { %385 = vmatprep.mubr.msk.bf16.mxu1 %vm202_vm0, %v411_v17  ;;  %v415_v24 = vld [vmem:[%s519_s0 + $0x18] ss:$12 sps:$4 sm:$0xff]  }
   0xa   :  { %382 = vmatpush3.bf16.msra.mxu1 %v404_v11 }
   0xb   :  { %351 = vmatpush3.bf16.msra.mxu0 %v394_v5  ;;  %383 = vmatprep.subr.bf16.mxu1 %v407_v14 }
   0xc   :  { %352 = vmatprep.subr.bf16.mxu0 %v395_v6 }
   0xe   :  { %384 = vmatpush3.bf16.msra.mxu1 %v407_v14 }
   0xf   :  { %353 = vmatpush3.bf16.msra.mxu0 %v396_v7 }
  0x10   :  { %354 = vmatprep.subr.bf16.mxu0 %v397_v8 }
  0x11   :  { %386 = vmatmul.mubr.msk.bf16.vlgmr.msra.gmra.mrb[0].mxu1 %vm202_vm0, %v412_v18 }
  0x13   :  { %355 = vmatpush3.bf16.msra.mxu0 %v398_v10 }
  0x14   :  { %356 = vmatprep.subr.bf16.mxu0 %v399_v12 }
  0x17   :  { %357 = vmatpush3.bf16.msra.mxu0 %v400_v13 }
  0x18   :  { %358 = vmatprep.subr.bf16.mxu0 %v402_v15 }
  0x1b   :  { %359 = vmatpush3.bf16.msra.mxu0 %v403_v19 }
  0x1c   :  { %360 = vmatprep.subr.bf16.mxu0 %v405_v20 }
  0x1f   :  { %361 = vmatpush3.bf16.msra.mxu0 %v406_v21 }
  0x22   :  { %242 = vmatmul.mubr.bf16.vlgmr.msra.gmra.mrb[0].mxu0 %v408_v22 }
  0x23   :  { %249 = vmatprep.mubr.bf16.mxu0 %v413_v23 }
  0x2a   :  { %250 = vmatmul.mubr.bf16.gmra.mrb[4].mxu0 %v415_v24 }
  0xe4   :  { %v387_v25 = vpop.f32.mrb[0].mxu1 }
  0xe5   :  { %v292_v26 = vpop.f32.mrb[1].mxu1 }
  0xe6   :  { %v388_v27 = vpop.f32.mrb[2].mxu1 }
  0xe7   :  { %v295_v28 = vpop.f32.mrb[3].mxu1 }
  0xf5   :  { %v362_v29 = vpop.f32.mrb[0].mxu0 }
  0xf6   :  { %v363_v30 = vpop.f32.mrb[1].mxu0 }
  0xf7   :  { %v364_v31 = vadd.f32 %v363_v30, %v362_v29  ;;  %v365_v32 = vpop.f32.mrb[2].mxu0 }
  0xf8   :  { %v366_v33 = vpop.f32.mrb[3].mxu0 }
  0xf9   :  { %v367_v34 = vadd.f32 %v366_v33, %v365_v32  ;;  %v293_v35 = vadd.f32 %v364_v31, %v292_v26 }
  0xfb   :  { %v307_v36 = vmax.f32 %v293_v35, 0.0  ;;  %v296_v37 = vadd.f32 %v367_v34, %v295_v28 }
  0xfd   :  { %311 = vst [vmem:[%s520_s2] sm:$0xff] %v307_v36  ;;  %v308_v38 = vmax.f32 %v296_v37, 0.0  ;;  %v368_v39 = vpop.f32.mrb[4].mxu0 }
  0xfe   :  { %v369_v40 = vpop.f32.mrb[5].mxu0 }
  0xff   :  { %312 = vst [vmem:[%s520_s2 + $0x8] sm:$0xff] %v308_v38  ;;  %v370_v41 = vadd.f32 %v369_v40, %v368_v39  ;;  %v371_v42 = vpop.f32.mrb[6].mxu0 }
 0x100   :  { %v372_v43 = vpop.f32.mrb[7].mxu0 }
 0x101   :  { %v301_v44 = vadd.f32 %v387_v25, %v370_v41  ;;  %v373_v45 = vadd.f32 %v372_v43, %v371_v42 }
 0x103   :  { %v309_v46 = vmax.f32 %v301_v44, 0.0  ;;  %v304_v47 = vadd.f32 %v388_v27, %v373_v45 }
 0x105   :  { %313 = vst [vmem:[%s520_s2 + $0x10] sm:$0xff] %v309_v46  ;;  %v310_v48 = vmax.f32 %v304_v47, 0.0 }
 0x107   :  { %314 = vst [vmem:[%s520_s2 + $0x18] sm:$0xff] %v310_v48 }

// kernel: disp_resnet_forward.12
= control target key start
LH: loop header
LB: loop body
LE: loop exit
PB: predicated region body
PF: predicated region fallthrough
CT: control target
= control target key end

     0   :  { %vm209_vm0 = vcmask 392192   ;;  %s542_s1 = inlined_call_operand.vmem [shape: bf16[304,128], index: 1, kind: input, shape index: {}]   ;;  %s543_s0 = inlined_call_operand.vmem [shape: bf16[32,304], index: 0, kind: input, shape index: {}]   ;;  %s544_s2 = inlined_call_operand.vmem [shape: f32[32,128], index: 2, kind: input, shape index: {}]   ;;  %s545_s3 = inlined_call_operand.vmem [shape: f32[32,128], index: 3, kind: output, shape index: {}]  }
   0x1   :  { %v396_v0 = vld [vmem:[%s542_s1 + $0x40] sm:$0xff]   ;;  %v398_v2 = vld [vmem:[%s542_s1 + $0x48] sm:$0xff]   ;;  %v400_v4 = vld [vmem:[%s542_s1 + $0x50] sm:$0xff]  }
   0x2   :  { %v397_v1 = vld [vmem:[%s542_s1] sm:$0xff]   ;;  %353 = vmatprep.subr.bf16.mxu0 %v396_v0  ;;  %v399_v3 = vld [vmem:[%s542_s1 + $0x8] sm:$0xff]   ;;  %v401_v5 = vld [vmem:[%s542_s1 + $0x10] sm:$0xff]  }
   0x3   :  { %354 = vmatpush3.bf16.msra.mxu0 %v397_v1  ;;  %v402_v6 = vld [vmem:[%s542_s1 + $0x58] sm:$0xff]   ;;  %v404_v8 = vld [vmem:[%s542_s1 + $0x60] sm:$0xff]   ;;  %v406_v11 = vld [vmem:[%s542_s1 + $0x68] sm:$0xff]  }
   0x4   :  { %355 = vmatprep.subr.bf16.mxu0 %v398_v2  ;;  %v403_v7 = vld [vmem:[%s542_s1 + $0x18] sm:$0xff]   ;;  %v409_v9 = vld [vmem:[%s542_s1 + $0x80] sm:$0xff]   ;;  %v412_v12 = vld [vmem:[%s542_s1 + $0x88] sm:$0xff]  }
   0x5   :  { %v405_v10 = vld [vmem:[%s542_s1 + $0x20] sm:$0xff]   ;;  %386 = vmatprep.subr.bf16.mxu1 %v409_v9  ;;  %v407_v13 = vld [vmem:[%s542_s1 + $0x28] sm:$0xff]   ;;  %v408_v14 = vld [vmem:[%s542_s1 + $0x70] sm:$0xff]  }
   0x6   :  { %387 = vmatpush3.bf16.msra.mxu1 %v409_v9  ;;  %v416_v15 = vld [vmem:[%s543_s0 + $0x4] ss:$12 sps:$4 sm:$0xff]   ;;  %v418_v17 = vld [vmem:[%s543_s0 + $0x8] ss:$12 sps:$4 sm:$0xff]   ;;  %v419_v19 = vld [vmem:[%s543_s0 + $0x20] ss:$12 sps:$4 sm:$0xff]  }
   0x7   :  { %356 = vmatpush3.bf16.msra.mxu0 %v399_v3  ;;  %388 = vmatprep.subr.bf16.mxu1 %v412_v12  ;;  %v417_v16 = vld [vmem:[%s542_s1 + $0x90] sm:$0xff]   ;;  %v411_v20 = vld [vmem:[%s542_s1 + $0x78] sm:$0xff]   ;;  %v414_v22 = vld [vmem:[%s543_s0] ss:$12 sps:$4 sm:$0xff]  }
   0x8   :  { %357 = vmatprep.subr.bf16.mxu0 %v400_v4  ;;  %248 = vmatprep.mubr.bf16.mxu0 %v416_v15  ;;  %v410_v18 = vld [vmem:[%s542_s1 + $0x30] sm:$0xff]   ;;  %v413_v21 = vld [vmem:[%s542_s1 + $0x38] sm:$0xff]   ;;  %v61_v31 = vld [vmem:[%s544_s2] sm:$0xff] }
   0x9   :  { %392 = vmatprep.mubr.msk.bf16.mxu1 %vm209_vm0, %v418_v17  ;;  %v420_v23 = vld [vmem:[%s543_s0 + $0x1c] ss:$12 sps:$4 sm:$0xff]   ;;  %v422_v24 = vld [vmem:[%s543_s0 + $0x18] ss:$12 sps:$4 sm:$0xff]   ;;  %v63_v43 = vld [vmem:[%s544_s2 + $0x10] sm:$0xff] }
   0xa   :  { %389 = vmatpush3.bf16.msra.mxu1 %v412_v12  ;;  %v62_v35 = vld [vmem:[%s544_s2 + $0x8] sm:$0xff]  ;;  %v64_v48 = vld [vmem:[%s544_s2 + $0x18] sm:$0xff] }
   0xb   :  { %358 = vmatpush3.bf16.msra.mxu0 %v401_v5  ;;  %390 = vmatprep.subr.bf16.mxu1 %v417_v16 }
   0xc   :  { %359 = vmatprep.subr.bf16.mxu0 %v402_v6 }
   0xe   :  { %391 = vmatpush3.bf16.msra.mxu1 %v417_v16 }
   0xf   :  { %360 = vmatpush3.bf16.msra.mxu0 %v403_v7 }
  0x10   :  { %361 = vmatprep.subr.bf16.mxu0 %v404_v8 }
  0x11   :  { %393 = vmatmul.mubr.msk.bf16.vlgmr.msra.gmra.mrb[0].mxu1 %vm209_vm0, %v419_v19 }
  0x13   :  { %362 = vmatpush3.bf16.msra.mxu0 %v405_v10 }
  0x14   :  { %363 = vmatprep.subr.bf16.mxu0 %v406_v11 }
  0x17   :  { %364 = vmatpush3.bf16.msra.mxu0 %v407_v13 }
  0x18   :  { %365 = vmatprep.subr.bf16.mxu0 %v408_v14 }
  0x1b   :  { %366 = vmatpush3.bf16.msra.mxu0 %v410_v18 }
  0x1c   :  { %367 = vmatprep.subr.bf16.mxu0 %v411_v20 }
  0x1f   :  { %368 = vmatpush3.bf16.msra.mxu0 %v413_v21 }
  0x22   :  { %249 = vmatmul.mubr.bf16.vlgmr.msra.gmra.mrb[0].mxu0 %v414_v22 }
  0x23   :  { %256 = vmatprep.mubr.bf16.mxu0 %v420_v23 }
  0x2a   :  { %257 = vmatmul.mubr.bf16.gmra.mrb[4].mxu0 %v422_v24 }
  0xe4   :  { %v394_v25 = vpop.f32.mrb[0].mxu1 }
  0xe5   :  { %v299_v26 = vpop.f32.mrb[1].mxu1 }
  0xe6   :  { %v395_v27 = vpop.f32.mrb[2].mxu1 }
  0xe7   :  { %v302_v28 = vpop.f32.mrb[3].mxu1 }
  0xf5   :  { %v369_v29 = vpop.f32.mrb[0].mxu0 }
  0xf6   :  { %v370_v30 = vpop.f32.mrb[1].mxu0 }
  0xf7   :  { %v371_v32 = vadd.f32 %v370_v30, %v369_v29  ;;  %v372_v33 = vpop.f32.mrb[2].mxu0 }
  0xf8   :  { %v373_v34 = vpop.f32.mrb[3].mxu0 }
  0xf9   :  { %v374_v36 = vadd.f32 %v373_v34, %v372_v33  ;;  %v251_v37 = vadd.f32 %v371_v32, %v61_v31 }
  0xfb   :  { %v300_v38 = vadd.f32 %v299_v26, %v251_v37  ;;  %v254_v39 = vadd.f32 %v374_v36, %v62_v35 }
  0xfd   :  { %v314_v40 = vmax.f32 %v300_v38, 0.0  ;;  %v303_v41 = vadd.f32 %v302_v28, %v254_v39  ;;  %v375_v42 = vpop.f32.mrb[4].mxu0 }
  0xfe   :  { %v376_v44 = vpop.f32.mrb[5].mxu0 }
  0xff   :  { %318 = vst [vmem:[%s545_s3] sm:$0xff] %v314_v40  ;;  %v315_v45 = vmax.f32 %v303_v41, 0.0  ;;  %v377_v46 = vadd.f32 %v376_v44, %v375_v42  ;;  %v378_v47 = vpop.f32.mrb[6].mxu0 }
 0x100   :  { %v379_v49 = vpop.f32.mrb[7].mxu0 }
 0x101   :  { %319 = vst [vmem:[%s545_s3 + $0x8] sm:$0xff] %v315_v45  ;;  %v259_v50 = vadd.f32 %v377_v46, %v63_v43  ;;  %v380_v51 = vadd.f32 %v379_v49, %v378_v47 }
 0x103   :  { %v308_v52 = vadd.f32 %v394_v25, %v259_v50  ;;  %v262_v53 = vadd.f32 %v380_v51, %v64_v48 }
 0x105   :  { %v316_v54 = vmax.f32 %v308_v52, 0.0  ;;  %v311_v55 = vadd.f32 %v395_v27, %v262_v53 }
 0x107   :  { %320 = vst [vmem:[%s545_s3 + $0x10] sm:$0xff] %v316_v54  ;;  %v317_v56 = vmax.f32 %v311_v55, 0.0 }
 0x109   :  { %321 = vst [vmem:[%s545_s3 + $0x18] sm:$0xff] %v317_v56 }

// kernel: disp_resnet_forward.13
= control target key start
LH: loop header
LB: loop body
LE: loop exit
PB: predicated region body
PF: predicated region fallthrough
CT: control target
= control target key end

     0   :  { %vm316_vm0 = vcmask 392192   ;;  %s998_s1 = inlined_call_operand.vmem [shape: bf16[304,128], index: 1, kind: input, shape index: {}]   ;;  %s999_s0 = inlined_call_operand.vmem [shape: bf16[128,304], index: 0, kind: input, shape index: {}]   ;;  %s1000_s2 = inlined_call_operand.vmem [shape: f32[128,128], index: 2, kind: output, shape index: {}]  }
   0x1   :  { %v735_v0 = vld [vmem:[%s998_s1 + $0x40] sm:$0xff]   ;;  %v737_v2 = vld [vmem:[%s998_s1 + $0x48] sm:$0xff]   ;;  %v739_v4 = vld [vmem:[%s998_s1 + $0x50] sm:$0xff]  }
   0x2   :  { %v736_v1 = vld [vmem:[%s998_s1] sm:$0xff]   ;;  %622 = vmatprep.subr.bf16.mxu0 %v735_v0  ;;  %719 = vmatprep.subr.bf16.mxu1 %v735_v0  ;;  %v738_v3 = vld [vmem:[%s998_s1 + $0x8] sm:$0xff]   ;;  %v740_v5 = vld [vmem:[%s998_s1 + $0x10] sm:$0xff]  }
   0x3   :  { %623 = vmatpush3.bf16.msra.mxu0 %v736_v1  ;;  %727 = vmatpush3.bf16.msra.mxu1 %v736_v1  ;;  %v741_v6 = vld [vmem:[%s998_s1 + $0x58] sm:$0xff]   ;;  %v743_v8 = vld [vmem:[%s998_s1 + $0x60] sm:$0xff]   ;;  %v745_v10 = vld [vmem:[%s998_s1 + $0x68] sm:$0xff]  }
   0x4   :  { %624 = vmatprep.subr.bf16.mxu0 %v737_v2  ;;  %720 = vmatprep.subr.bf16.mxu1 %v737_v2  ;;  %v742_v7 = vld [vmem:[%s998_s1 + $0x18] sm:$0xff]   ;;  %v744_v9 = vld [vmem:[%s998_s1 + $0x20] sm:$0xff]   ;;  %v746_v13 = vld [vmem:[%s998_s1 + $0x28] sm:$0xff]  }
   0x5   :  { %v753_v11 = vld [vmem:[%s999_s0 + $0x4] ss:$12 sps:$4 sm:$0xff]   ;;  %v756_v12 = vld [vmem:[%s999_s0 + $0x94] ss:$12 sps:$4 sm:$0xff]   ;;  %v749_v16 = vld [vmem:[%s998_s1 + $0x78] sm:$0xff]  }
   0x6   :  { %v747_v14 = vld [vmem:[%s998_s1 + $0x70] sm:$0xff]   ;;  %373 = vmatprep.mubr.bf16.mxu0 %v753_v11  ;;  %421 = vmatprep.mubr.bf16.mxu1 %v756_v12  ;;  %v750_v17 = vld [vmem:[%s998_s1 + $0x38] sm:$0xff]   ;;  %v757_v18 = vld [vmem:[%s998_s1 + $0x80] sm:$0xff]  }
   0x7   :  { %625 = vmatpush3.bf16.msra.mxu0 %v738_v3  ;;  %728 = vmatpush3.bf16.msra.mxu1 %v738_v3  ;;  %v748_v15 = vld [vmem:[%s998_s1 + $0x30] sm:$0xff]   ;;  %v751_v19 = vld [vmem:[%s999_s0] ss:$12 sps:$4 sm:$0xff]   ;;  %v758_v21 = vld [vmem:[%s999_s0 + $0x1c] ss:$12 sps:$4 sm:$0xff]  }
   0x8   :  { %626 = vmatprep.subr.bf16.mxu0 %v739_v4  ;;  %721 = vmatprep.subr.bf16.mxu1 %v739_v4  ;;  %v754_v20 = vld [vmem:[%s999_s0 + $0x90] ss:$12 sps:$4 sm:$0xff]   ;;  %v760_v22 = vld [vmem:[%s999_s0 + $0xac] ss:$12 sps:$4 sm:$0xff]   ;;  %v764_v26 = vld [vmem:[%s999_s0 + $0xa8] ss:$12 sps:$4 sm:$0xff]  }
   0x9   :  { %v762_v23 = vld [vmem:[%s998_s1 + $0x88] sm:$0xff]   ;;  %v765_v24 = vld [vmem:[%s998_s1 + $0x90] sm:$0xff]   ;;  %v763_v25 = vld [vmem:[%s999_s0 + $0x18] ss:$12 sps:$4 sm:$0xff]  }
   0xa   :  { %v766_v27 = vld [vmem:[%s999_s0 + $0x34] ss:$12 sps:$4 sm:$0xff]   ;;  %v769_v29 = vld [vmem:[%s999_s0 + $0x30] ss:$12 sps:$4 sm:$0xff]   ;;  %v771_v31 = vld [vmem:[%s999_s0 + $0x4c] ss:$12 sps:$4 sm:$0xff]  }
   0xb   :  { %627 = vmatpush3.bf16.msra.mxu0 %v740_v5  ;;  %729 = vmatpush3.bf16.msra.mxu1 %v740_v5  ;;  %v768_v28 = vld [vmem:[%s999_s0 + $0x8] ss:$12 sps:$4 sm:$0xff]   ;;  %v770_v30 = vld [vmem:[%s999_s0 + $0x20] ss:$12 sps:$4 sm:$0xff]   ;;  %v773_v32 = vld [vmem:[%s999_s0 + $0x38] ss:$12 sps:$4 sm:$0xff]  }
   0xc   :  { %628 = vmatprep.subr.bf16.mxu0 %v741_v6  ;;  %722 = vmatprep.subr.bf16.mxu1 %v741_v6  ;;  %v774_v33 = vld [vmem:[%s999_s0 + $0x48] ss:$12 sps:$4 sm:$0xff]   ;;  %v775_v34 = vld [vmem:[%s999_s0 + $0x50] ss:$12 sps:$4 sm:$0xff]   ;;  %v779_v37 = vld [vmem:[%s999_s0 + $0x60] ss:$12 sps:$4 sm:$0xff]  }
   0xd   :  { %v776_v35 = vld [vmem:[%s999_s0 + $0x64] ss:$12 sps:$4 sm:$0xff]   ;;  %v778_v36 = vld [vmem:[%s999_s0 + $0x68] ss:$12 sps:$4 sm:$0xff]   ;;  %v780_v38 = vld [vmem:[%s999_s0 + $0x80] ss:$12 sps:$4 sm:$0xff]  }
   0xe   :  { %v781_v39 = vld [vmem:[%s999_s0 + $0x7c] ss:$12 sps:$4 sm:$0xff]   ;;  %v783_v40 = vld [vmem:[%s999_s0 + $0x98] ss:$12 sps:$4 sm:$0xff]  }
   0xf   :  { %629 = vmatpush3.bf16.msra.mxu0 %v742_v7  ;;  %730 = vmatpush3.bf16.msra.mxu1 %v742_v7  ;;  %v784_v41 = vld [vmem:[%s999_s0 + $0x78] ss:$12 sps:$4 sm:$0xff]   ;;  %v785_v42 = vld [vmem:[%s999_s0 + $0xb0] ss:$12 sps:$4 sm:$0xff]  }
  0x10   :  { %630 = vmatprep.subr.bf16.mxu0 %v743_v8  ;;  %723 = vmatprep.subr.bf16.mxu1 %v743_v8 }
  0x13   :  { %631 = vmatpush3.bf16.msra.mxu0 %v744_v9  ;;  %731 = vmatpush3.bf16.msra.mxu1 %v744_v9 }
  0x14   :  { %632 = vmatprep.subr.bf16.mxu0 %v745_v10  ;;  %724 = vmatprep.subr.bf16.mxu1 %v745_v10 }
  0x17   :  { %633 = vmatpush3.bf16.msra.mxu0 %v746_v13  ;;  %732 = vmatpush3.bf16.msra.mxu1 %v746_v13 }
  0x18   :  { %634 = vmatprep.subr.bf16.mxu0 %v747_v14  ;;  %725 = vmatprep.subr.bf16.mxu1 %v747_v14 }
  0x1b   :  { %635 = vmatpush3.bf16.msra.mxu0 %v748_v15  ;;  %733 = vmatpush3.bf16.msra.mxu1 %v748_v15 }
  0x1c   :  { %636 = vmatprep.subr.bf16.mxu0 %v749_v16  ;;  %726 = vmatprep.subr.bf16.mxu1 %v749_v16 }
  0x1f   :  { %637 = vmatpush3.bf16.msra.mxu0 %v750_v17  ;;  %734 = vmatpush3.bf16.msra.mxu1 %v750_v17 }
  0x20   :  { %697 = vmatprep.subr.bf16.mxu1 %v757_v18 }
  0x22   :  { %374 = vmatmul.mubr.bf16.vlgmr.msra.gmra.mrb[0].mxu0 %v751_v19  ;;  %422 = vmatmul.mubr.bf16.vlgmr.msra.gmra.mrb[0].mxu1 %v754_v20 }
  0x23   :  { %698 = vmatpush3.bf16.msra.mxu1 %v757_v18  ;;  %381 = vmatprep.mubr.bf16.mxu0 %v758_v21 }
  0x24   :  { %429 = vmatprep.mubr.bf16.mxu1 %v760_v22  ;;  %699 = vmatprep.subr.bf16.mxu1 %v762_v23 }
  0x27   :  { %700 = vmatpush3.bf16.msra.mxu1 %v762_v23 }
  0x28   :  { %701 = vmatprep.subr.bf16.mxu1 %v765_v24 }
  0x2a   :  { %382 = vmatmul.mubr.bf16.gmra.mrb[4].mxu0 %v763_v25  ;;  %430 = vmatmul.mubr.bf16.gmra.mrb[4].mxu1 %v764_v26 }
  0x2b   :  { %702 = vmatpush3.bf16.msra.mxu1 %v765_v24  ;;  %389 = vmatprep.mubr.bf16.mxu0 %v766_v27 }
  0x2c   :  { %703 = vmatprep.mubr.msk.bf16.mxu1 %vm316_vm0, %v768_v28 }
  0x32   :  { %390 = vmatmul.mubr.bf16.gmra.mrb[8].mxu0 %v769_v29  ;;  %704 = vmatmul.mubr.msk.bf16.vlgmr.msra.gmra.mrb[8].mxu1 %vm316_vm0, %v770_v30 }
  0x33   :  { %397 = vmatprep.mubr.bf16.mxu0 %v771_v31  ;;  %707 = vmatprep.mubr.msk.bf16.mxu1 %vm316_vm0, %v773_v32 }
  0x3a   :  { %398 = vmatmul.mubr.bf16.gmra.mrb[12].mxu0 %v774_v33  ;;  %708 = vmatmul.mubr.msk.bf16.gmra.mrb[12].mxu1 %vm316_vm0, %v775_v34 }
  0x3b   :  { %405 = vmatprep.mubr.bf16.mxu0 %v776_v35  ;;  %711 = vmatprep.mubr.msk.bf16.mxu1 %vm316_vm0, %v778_v36 }
  0x42   :  { %406 = vmatmul.mubr.bf16.gmra.mrb[16].mxu0 %v779_v37  ;;  %712 = vmatmul.mubr.msk.bf16.gmra.mrb[16].mxu1 %vm316_vm0, %v780_v38 }
  0x43   :  { %413 = vmatprep.mubr.bf16.mxu0 %v781_v39  ;;  %715 = vmatprep.mubr.msk.bf16.mxu1 %vm316_vm0, %v783_v40 }
  0x4a   :  { %414 = vmatmul.mubr.bf16.gmra.mrb[20].mxu0 %v784_v41  ;;  %716 = vmatmul.mubr.msk.bf16.gmra.mrb[20].mxu1 %vm316_vm0, %v785_v42 }
  0xf5   :  { %v638_v43 = vpop.f32.mrb[0].mxu0  ;;  %v674_v44 = vpop.f32.mrb[0].mxu1 }
  0xf6   :  { %v639_v45 = vpop.f32.mrb[1].mxu0  ;;  %v675_v46 = vpop.f32.mrb[1].mxu1 }
  0xf7   :  { %v640_v47 = vadd.f32 %v639_v45, %v638_v43  ;;  %v938_v48 = vadd.f32 %v675_v46, %v674_v44  ;;  %v641_v49 = vpop.f32.mrb[2].mxu0  ;;  %v677_v50 = vpop.f32.mrb[2].mxu1 }
  0xf8   :  { %v642_v51 = vpop.f32.mrb[3].mxu0  ;;  %v678_v52 = vpop.f32.mrb[3].mxu1 }
  0xf9   :  { %v643_v53 = vadd.f32 %v642_v51, %v641_v49  ;;  %v940_v54 = vadd.f32 %v678_v52, %v677_v50 }
  0xfd   :  { %v644_v55 = vpop.f32.mrb[4].mxu0  ;;  %v680_v56 = vpop.f32.mrb[4].mxu1 }
  0xfe   :  { %v645_v57 = vpop.f32.mrb[5].mxu0  ;;  %v681_v58 = vpop.f32.mrb[5].mxu1 }
  0xff   :  { %v646_v59 = vadd.f32 %v645_v57, %v644_v55  ;;  %v942_v60 = vadd.f32 %v681_v58, %v680_v56  ;;  %v647_v61 = vpop.f32.mrb[6].mxu0  ;;  %v683_v62 = vpop.f32.mrb[6].mxu1 }
 0x100   :  { %v648_v63 = vpop.f32.mrb[7].mxu0  ;;  %v684_v0 = vpop.f32.mrb[7].mxu1 }
 0x101   :  { %v649_v1 = vadd.f32 %v648_v63, %v647_v61  ;;  %v944_v2 = vadd.f32 %v684_v0, %v683_v62 }
 0x105   :  { %v650_v3 = vpop.f32.mrb[8].mxu0  ;;  %v705_v4 = vpop.f32.mrb[8].mxu1 }
 0x106   :  { %v481_v5 = vadd.f32 %v705_v4, %v646_v59  ;;  %v651_v6 = vpop.f32.mrb[9].mxu0  ;;  %v472_v7 = vpop.f32.mrb[9].mxu1 }
 0x107   :  { %v652_v8 = vadd.f32 %v651_v6, %v650_v3  ;;  %v473_v9 = vadd.f32 %v640_v47, %v472_v7  ;;  %v653_v10 = vpop.f32.mrb[10].mxu0  ;;  %v706_v11 = vpop.f32.mrb[10].mxu1 }
 0x108   :  { %v537_v12 = vmax.f32 %v481_v5, 0.0  ;;  %v484_v13 = vadd.f32 %v706_v11, %v649_v1  ;;  %v654_v14 = vpop.f32.mrb[11].mxu0  ;;  %v475_v15 = vpop.f32.mrb[11].mxu1 }
 0x109   :  { %v535_v16 = vmax.f32 %v473_v9, 0.0  ;;  %v655_v17 = vadd.f32 %v654_v14, %v653_v10  ;;  %v476_v18 = vadd.f32 %v643_v53, %v475_v15 }
 0x10a   :  { %553 = vst [vmem:[%s1000_s2 + $0x10] sm:$0xff] %v537_v12  ;;  %v538_v19 = vmax.f32 %v484_v13, 0.0 }
 0x10b   :  { %551 = vst [vmem:[%s1000_s2] sm:$0xff] %v535_v16  ;;  %v536_v20 = vmax.f32 %v476_v18, 0.0 }
 0x10c   :  { %554 = vst [vmem:[%s1000_s2 + $0x18] sm:$0xff] %v538_v19 }
 0x10d   :  { %552 = vst [vmem:[%s1000_s2 + $0x8] sm:$0xff] %v536_v20  ;;  %v656_v21 = vpop.f32.mrb[12].mxu0  ;;  %v709_v22 = vpop.f32.mrb[12].mxu1 }
 0x10e   :  { %v657_v23 = vpop.f32.mrb[13].mxu0  ;;  %v488_v24 = vpop.f32.mrb[13].mxu1 }
 0x10f   :  { %v658_v25 = vadd.f32 %v657_v23, %v656_v21  ;;  %v489_v26 = vadd.f32 %v652_v8, %v488_v24  ;;  %v659_v27 = vpop.f32.mrb[14].mxu0  ;;  %v710_v28 = vpop.f32.mrb[14].mxu1 }
 0x110   :  { %v660_v29 = vpop.f32.mrb[15].mxu0  ;;  %v491_v30 = vpop.f32.mrb[15].mxu1 }
 0x111   :  { %v497_v31 = vadd.f32 %v709_v22, %v658_v25  ;;  %v539_v32 = vmax.f32 %v489_v26, 0.0  ;;  %v661_v33 = vadd.f32 %v660_v29, %v659_v27  ;;  %v492_v34 = vadd.f32 %v655_v17, %v491_v30 }
 0x113   :  { %v541_v35 = vmax.f32 %v497_v31, 0.0  ;;  %555 = vst [vmem:[%s1000_s2 + $0x20] sm:$0xff] %v539_v32  ;;  %v500_v36 = vadd.f32 %v710_v28, %v661_v33  ;;  %v540_v37 = vmax.f32 %v492_v34, 0.0 }
 0x115   :  { %557 = vst [vmem:[%s1000_s2 + $0x30] sm:$0xff] %v541_v35  ;;  %v542_v38 = vmax.f32 %v500_v36, 0.0  ;;  %556 = vst [vmem:[%s1000_s2 + $0x28] sm:$0xff] %v540_v37  ;;  %v662_v39 = vpop.f32.mrb[16].mxu0  ;;  %v713_v40 = vpop.f32.mrb[16].mxu1 }
 0x116   :  { %v663_v41 = vpop.f32.mrb[17].mxu0  ;;  %v504_v42 = vpop.f32.mrb[17].mxu1 }
 0x117   :  { %558 = vst [vmem:[%s1000_s2 + $0x38] sm:$0xff] %v542_v38  ;;  %v664_v43 = vadd.f32 %v663_v41, %v662_v39  ;;  %v665_v44 = vpop.f32.mrb[18].mxu0  ;;  %v714_v45 = vpop.f32.mrb[18].mxu1 }
 0x118   :  { %v666_v46 = vpop.f32.mrb[19].mxu0  ;;  %v507_v47 = vpop.f32.mrb[19].mxu1 }
 0x119   :  { %v505_v49 = vadd.f32 %v664_v43, %v504_v42  ;;  %v667_v50 = vadd.f32 %v666_v46, %v665_v44 }
 0x11b   :  { %v543_v51 = vmax.f32 %v505_v49, 0.0  ;;  %v508_v52 = vadd.f32 %v667_v50, %v507_v47 }
 0x11d   :  { %559 = vst [vmem:[%s1000_s2 + $0x40] sm:$0xff] %v543_v51  ;;  %v544_v53 = vmax.f32 %v508_v52, 0.0  ;;  %v668_v55 = vpop.f32.mrb[20].mxu0  ;;  %v717_v56 = vpop.f32.mrb[20].mxu1 }
 0x11e   :  { %v529_v57 = vadd.f32 %v717_v56, %v942_v60  ;;  %v669_v58 = vpop.f32.mrb[21].mxu0  ;;  %v520_v59 = vpop.f32.mrb[21].mxu1 }
 0x11f   :  { %560 = vst [vmem:[%s1000_s2 + $0x48] sm:$0xff] %v544_v53  ;;  %v670_v61 = vadd.f32 %v669_v58, %v668_v55  ;;  %v521_v62 = vadd.f32 %v938_v48, %v520_v59  ;;  %v671_v63 = vpop.f32.mrb[22].mxu0  ;;  %v718_v0 = vpop.f32.mrb[22].mxu1 }
 0x120   :  { %v549_v1 = vmax.f32 %v529_v57, 0.0  ;;  %v532_v3 = vadd.f32 %v718_v0, %v944_v2  ;;  %v672_v4 = vpop.f32.mrb[23].mxu0  ;;  %v523_v5 = vpop.f32.mrb[23].mxu1 }
 0x121   :  { %v513_v6 = vadd.f32 %v713_v40, %v670_v61  ;;  %v547_v7 = vmax.f32 %v521_v62, 0.0  ;;  %v673_v8 = vadd.f32 %v672_v4, %v671_v63  ;;  %v524_v60 = vadd.f32 %v940_v54, %v523_v5 }
 0x122   :  { %565 = vst [vmem:[%s1000_s2 + $0x70] sm:$0xff] %v549_v1  ;;  %v550_v9 = vmax.f32 %v532_v3, 0.0 }
 0x123   :  { %v545_v10 = vmax.f32 %v513_v6, 0.0  ;;  %563 = vst [vmem:[%s1000_s2 + $0x60] sm:$0xff] %v547_v7  ;;  %v516_v48 = vadd.f32 %v714_v45, %v673_v8  ;;  %v548_v11 = vmax.f32 %v524_v60, 0.0 }
 0x124   :  { %566 = vst [vmem:[%s1000_s2 + $0x78] sm:$0xff] %v550_v9 }
 0x125   :  { %561 = vst [vmem:[%s1000_s2 + $0x50] sm:$0xff] %v545_v10  ;;  %v546_v54 = vmax.f32 %v516_v48, 0.0  ;;  %564 = vst [vmem:[%s1000_s2 + $0x68] sm:$0xff] %v548_v11 }
 0x127   :  { %562 = vst [vmem:[%s1000_s2 + $0x58] sm:$0xff] %v546_v54 }

// kernel: disp_resnet_forward.14
= control target key start
LH: loop header
LB: loop body
LE: loop exit
PB: predicated region body
PF: predicated region fallthrough
CT: control target
= control target key end

     0   :  { %v777_v0 = vmov 0   ;;  %vm214_vm0 = vcmask 130048   ;;  %vm468_vm1 = vcmask 261120   ;;  %s1039_s1 = inlined_call_operand.vmem [shape: bf16[160,128], index: 1, kind: input, shape index: {}]   ;;  %s1040_s3 = inlined_call_operand.vmem [shape: bf16[144,128], index: 3, kind: input, shape index: {}]   ;;  %s1041_s2 = inlined_call_operand.vmem [shape: bf16[128,144], index: 2, kind: input, shape index: {}]   ;;  %s1042_s0 = inlined_call_operand.vmem [shape: bf16[128,160], index: 0, kind: input, shape index: {}]   ;;  %s1043_s4 = inlined_call_operand.vmem [shape: f32[128,128], index: 4, kind: output, shape index: {}]  }
   0x1   :  { %493 = vmatprep.subr.bf16.mxu0 %v777_v0  ;;  %239 = vmatprep.subr.bf16.mxu1 %v777_v0  ;;  %v710_v1 = vld [vmem:[%s1039_s1] sm:$0xff]   ;;  %v712_v3 = vld [vmem:[%s1039_s1 + $0x8] sm:$0xff]   ;;  %v714_v5 = vld [vmem:[%s1039_s1 + $0x10] sm:$0xff]  }
   0x2   :  { %v711_v2 = vld [vmem:[%s1040_s3] sm:$0xff]   ;;  %494 = vmatpush1.bf16.msra.mxu0 %v710_v1  ;;  %v713_v4 = vld [vmem:[%s1040_s3 + $0x8] sm:$0xff]   ;;  %v715_v6 = vld [vmem:[%s1040_s3 + $0x10] sm:$0xff]  }
   0x3   :  { %240 = vmatpush1.bf16.msra.mxu1 %v711_v2  ;;  %495 = vmatprep.subr.bf16.mxu0 %v777_v0  ;;  %v716_v7 = vld [vmem:[%s1039_s1 + $0x18] sm:$0xff]   ;;  %v718_v9 = vld [vmem:[%s1039_s1 + $0x20] sm:$0xff]   ;;  %v720_v11 = vld [vmem:[%s1039_s1 + $0x28] sm:$0xff]  }
   0x4   :  { %241 = vmatprep.subr.bf16.mxu1 %v777_v0  ;;  %v717_v8 = vld [vmem:[%s1040_s3 + $0x18] sm:$0xff]   ;;  %v719_v10 = vld [vmem:[%s1040_s3 + $0x20] sm:$0xff]   ;;  %v721_v12 = vld [vmem:[%s1040_s3 + $0x28] sm:$0xff]  }
   0x5   :  { %v730_v13 = vld [vmem:[%s1041_s2 + $0x4] ss:$8 sps:$4 sm:$0xff]   ;;  %v722_v15 = vld [vmem:[%s1039_s1 + $0x30] sm:$0xff]   ;;  %v724_v17 = vld [vmem:[%s1039_s1 + $0x38] sm:$0xff]  }
   0x6   :  { %496 = vmatpush1.bf16.msra.mxu0 %v712_v3  ;;  %651 = vmatprep.mubr.msk.bf16.mxu1 %vm214_vm0, %v730_v13  ;;  %v734_v14 = vld [vmem:[%s1042_s0 + $0x4] ss:$8 sps:$4 sm:$0xff]   ;;  %v723_v16 = vld [vmem:[%s1040_s3 + $0x30] sm:$0xff]   ;;  %v725_v18 = vld [vmem:[%s1040_s3 + $0x38] sm:$0xff]  }
   0x7   :  { %242 = vmatpush1.bf16.msra.mxu1 %v713_v4  ;;  %497 = vmatprep.subr.bf16.mxu0 %v777_v0  ;;  %v726_v19 = vld [vmem:[%s1039_s1 + $0x40] sm:$0xff]   ;;  %v731_v22 = vld [vmem:[%s1039_s1 + $0x48] sm:$0xff]   ;;  %v735_v23 = vld [vmem:[%s1041_s2 + $0x14] ss:$8 sps:$4 sm:$0xff]  }
   0x8   :  { %243 = vmatprep.subr.bf16.mxu1 %v777_v0  ;;  %685 = vmatprep.mubr.msk.bf16.mxu0 %vm468_vm1, %v734_v14  ;;  %v727_v20 = vld [vmem:[%s1040_s3 + $0x40] sm:$0xff]   ;;  %v738_v25 = vld [vmem:[%s1042_s0 + $0x14] ss:$8 sps:$4 sm:$0xff]   ;;  %v737_v26 = vld [vmem:[%s1041_s2 + $0x10] ss:$8 sps:$4 sm:$0xff]  }
   0x9   :  { %v728_v21 = vld [vmem:[%s1041_s2] ss:$8 sps:$4 sm:$0xff]   ;;  %v741_v27 = vld [vmem:[%s1041_s2 + $0x24] ss:$8 sps:$4 sm:$0xff]   ;;  %v740_v28 = vld [vmem:[%s1042_s0 + $0x10] ss:$8 sps:$4 sm:$0xff]  }
   0xa   :  { %498 = vmatpush1.bf16.msra.mxu0 %v714_v5  ;;  %v732_v24 = vld [vmem:[%s1042_s0] ss:$8 sps:$4 sm:$0xff]   ;;  %v744_v29 = vld [vmem:[%s1042_s0 + $0x24] ss:$8 sps:$4 sm:$0xff]   ;;  %v747_v31 = vld [vmem:[%s1041_s2 + $0x34] ss:$8 sps:$4 sm:$0xff]  }
   0xb   :  { %244 = vmatpush1.bf16.msra.mxu1 %v715_v6  ;;  %499 = vmatprep.subr.bf16.mxu0 %v777_v0  ;;  %v743_v30 = vld [vmem:[%s1041_s2 + $0x20] ss:$8 sps:$4 sm:$0xff]   ;;  %v750_v33 = vld [vmem:[%s1042_s0 + $0x34] ss:$8 sps:$4 sm:$0xff]   ;;  %v749_v34 = vld [vmem:[%s1041_s2 + $0x30] ss:$8 sps:$4 sm:$0xff]  }
   0xc   :  { %245 = vmatprep.subr.bf16.mxu1 %v777_v0  ;;  %v746_v32 = vld [vmem:[%s1042_s0 + $0x20] ss:$8 sps:$4 sm:$0xff]   ;;  %v753_v35 = vld [vmem:[%s1041_s2 + $0x44] ss:$8 sps:$4 sm:$0xff]   ;;  %v752_v36 = vld [vmem:[%s1042_s0 + $0x30] ss:$8 sps:$4 sm:$0xff]  }
   0xd   :  { %v756_v37 = vld [vmem:[%s1042_s0 + $0x44] ss:$8 sps:$4 sm:$0xff]   ;;  %v755_v38 = vld [vmem:[%s1041_s2 + $0x40] ss:$8 sps:$4 sm:$0xff]   ;;  %v759_v39 = vld [vmem:[%s1041_s2 + $0x54] ss:$8 sps:$4 sm:$0xff]  }
   0xe   :  { %500 = vmatpush1.bf16.msra.mxu0 %v716_v7  ;;  %v758_v40 = vld [vmem:[%s1042_s0 + $0x40] ss:$8 sps:$4 sm:$0xff]   ;;  %v762_v41 = vld [vmem:[%s1042_s0 + $0x54] ss:$8 sps:$4 sm:$0xff]   ;;  %v761_v42 = vld [vmem:[%s1041_s2 + $0x50] ss:$8 sps:$4 sm:$0xff]  }
   0xf   :  { %246 = vmatpush1.bf16.msra.mxu1 %v717_v8  ;;  %501 = vmatprep.subr.bf16.mxu0 %v777_v0  ;;  %v765_v43 = vld [vmem:[%s1041_s2 + $0x64] ss:$8 sps:$4 sm:$0xff]   ;;  %v764_v44 = vld [vmem:[%s1042_s0 + $0x50] ss:$8 sps:$4 sm:$0xff]   ;;  %v767_v46 = vld [vmem:[%s1041_s2 + $0x60] ss:$8 sps:$4 sm:$0xff]  }
  0x10   :  { %247 = vmatprep.subr.bf16.mxu1 %v777_v0  ;;  %v768_v45 = vld [vmem:[%s1042_s0 + $0x64] ss:$8 sps:$4 sm:$0xff]   ;;  %v771_v47 = vld [vmem:[%s1041_s2 + $0x74] ss:$8 sps:$4 sm:$0xff]   ;;  %v770_v48 = vld [vmem:[%s1042_s0 + $0x60] ss:$8 sps:$4 sm:$0xff]  }
  0x11   :  { %v774_v49 = vld [vmem:[%s1042_s0 + $0x74] ss:$8 sps:$4 sm:$0xff]   ;;  %v773_v50 = vld [vmem:[%s1041_s2 + $0x70] ss:$8 sps:$4 sm:$0xff]  }
  0x12   :  { %502 = vmatpush1.bf16.msra.mxu0 %v718_v9  ;;  %v776_v51 = vld [vmem:[%s1042_s0 + $0x70] ss:$8 sps:$4 sm:$0xff]  }
  0x13   :  { %248 = vmatpush1.bf16.msra.mxu1 %v719_v10  ;;  %503 = vmatprep.subr.bf16.mxu0 %v777_v0 }
  0x14   :  { %249 = vmatprep.subr.bf16.mxu1 %v777_v0 }
  0x16   :  { %504 = vmatpush1.bf16.msra.mxu0 %v720_v11 }
  0x17   :  { %250 = vmatpush1.bf16.msra.mxu1 %v721_v12  ;;  %505 = vmatprep.subr.bf16.mxu0 %v777_v0 }
  0x18   :  { %251 = vmatprep.subr.bf16.mxu1 %v777_v0 }
  0x1a   :  { %506 = vmatpush1.bf16.msra.mxu0 %v722_v15 }
  0x1b   :  { %252 = vmatpush1.bf16.msra.mxu1 %v723_v16  ;;  %507 = vmatprep.subr.bf16.mxu0 %v777_v0 }
  0x1c   :  { %253 = vmatprep.subr.bf16.mxu1 %v777_v0 }
  0x1e   :  { %508 = vmatpush1.bf16.msra.mxu0 %v724_v17 }
  0x1f   :  { %254 = vmatpush1.bf16.msra.mxu1 %v725_v18  ;;  %509 = vmatprep.subr.bf16.mxu0 %v777_v0 }
  0x20   :  { %255 = vmatprep.subr.bf16.mxu1 %v777_v0 }
  0x22   :  { %510 = vmatpush1.bf16.msra.mxu0 %v726_v19 }
  0x23   :  { %256 = vmatpush1.bf16.msra.mxu1 %v727_v20  ;;  %511 = vmatprep.subr.bf16.mxu0 %v777_v0 }
  0x26   :  { %272 = vmatmul.mubr.bf16.vlgmr.msra.gmra.mrb[0].mxu1 %v728_v21  ;;  %512 = vmatpush1.bf16.msra.mxu0 %v731_v22 }
  0x27   :  { %652 = vmatprep.mubr.msk.bf16.mxu1 %vm214_vm0, %v735_v23 }
  0x29   :  { %526 = vmatmul.mubr.bf16.vlgmr.msra.gmra.mrb[0].mxu0 %v732_v24 }
  0x2a   :  { %686 = vmatprep.mubr.msk.bf16.mxu0 %vm468_vm1, %v738_v25 }
  0x2e   :  { %280 = vmatmul.mubr.bf16.gmra.mrb[4].mxu1 %v737_v26 }
  0x2f   :  { %653 = vmatprep.mubr.msk.bf16.mxu1 %vm214_vm0, %v741_v27 }
  0x31   :  { %534 = vmatmul.mubr.bf16.gmra.mrb[4].mxu0 %v740_v28 }
  0x32   :  { %687 = vmatprep.mubr.msk.bf16.mxu0 %vm468_vm1, %v744_v29 }
  0x36   :  { %288 = vmatmul.mubr.bf16.gmra.mrb[8].mxu1 %v743_v30 }
  0x37   :  { %654 = vmatprep.mubr.msk.bf16.mxu1 %vm214_vm0, %v747_v31 }
  0x39   :  { %542 = vmatmul.mubr.bf16.gmra.mrb[8].mxu0 %v746_v32 }
  0x3a   :  { %688 = vmatprep.mubr.msk.bf16.mxu0 %vm468_vm1, %v750_v33 }
  0x3e   :  { %296 = vmatmul.mubr.bf16.gmra.mrb[12].mxu1 %v749_v34 }
  0x3f   :  { %655 = vmatprep.mubr.msk.bf16.mxu1 %vm214_vm0, %v753_v35 }
  0x41   :  { %550 = vmatmul.mubr.bf16.gmra.mrb[12].mxu0 %v752_v36 }
  0x42   :  { %689 = vmatprep.mubr.msk.bf16.mxu0 %vm468_vm1, %v756_v37 }
  0x46   :  { %304 = vmatmul.mubr.bf16.gmra.mrb[16].mxu1 %v755_v38 }
  0x47   :  { %656 = vmatprep.mubr.msk.bf16.mxu1 %vm214_vm0, %v759_v39 }
  0x49   :  { %558 = vmatmul.mubr.bf16.gmra.mrb[16].mxu0 %v758_v40 }
  0x4a   :  { %690 = vmatprep.mubr.msk.bf16.mxu0 %vm468_vm1, %v762_v41 }
  0x4e   :  { %312 = vmatmul.mubr.bf16.gmra.mrb[20].mxu1 %v761_v42 }
  0x4f   :  { %657 = vmatprep.mubr.msk.bf16.mxu1 %vm214_vm0, %v765_v43 }
  0x51   :  { %566 = vmatmul.mubr.bf16.gmra.mrb[20].mxu0 %v764_v44 }
  0x52   :  { %691 = vmatprep.mubr.msk.bf16.mxu0 %vm468_vm1, %v768_v45 }
  0x56   :  { %320 = vmatmul.mubr.bf16.gmra.mrb[24].mxu1 %v767_v46 }
  0x57   :  { %658 = vmatprep.mubr.msk.bf16.mxu1 %vm214_vm0, %v771_v47 }
  0x59   :  { %574 = vmatmul.mubr.bf16.gmra.mrb[24].mxu0 %v770_v48 }
  0x5a   :  { %692 = vmatprep.mubr.msk.bf16.mxu0 %vm468_vm1, %v774_v49 }
  0x5e   :  { %328 = vmatmul.mubr.bf16.gmra.mrb[28].mxu1 %v773_v50 }
  0x61   :  { %582 = vmatmul.mubr.bf16.gmra.mrb[28].mxu0 %v776_v51 }
  0xf9   :  { %v273_v52 = vpop.f32.mrb[0].mxu1 }
  0xfa   :  { %v275_v53 = vpop.f32.mrb[1].mxu1 }
  0xfb   :  { %v276_v54 = vpop.f32.mrb[2].mxu1 }
  0xfc   :  { %v278_v55 = vpop.f32.mrb[3].mxu1  ;;  %v527_v56 = vpop.f32.mrb[0].mxu0 }
  0xfd   :  { %v528_v57 = vadd.f32 %v527_v56, %v273_v52  ;;  %v529_v58 = vpop.f32.mrb[1].mxu0 }
  0xfe   :  { %v530_v59 = vpop.f32.mrb[2].mxu0 }
  0xff   :  { %v590_v60 = vmax.f32 %v528_v57, 0.0  ;;  %v531_v61 = vadd.f32 %v530_v59, %v276_v54  ;;  %v532_v62 = vpop.f32.mrb[3].mxu0 }
 0x101   :  { %606 = vst [vmem:[%s1043_s4] sm:$0xff] %v590_v60  ;;  %v591_v63 = vmax.f32 %v531_v61, 0.0  ;;  %v281_v0 = vpop.f32.mrb[4].mxu1 }
 0x102   :  { %v283_v1 = vpop.f32.mrb[5].mxu1 }
 0x103   :  { %607 = vst [vmem:[%s1043_s4 + $0x8] sm:$0xff] %v591_v63  ;;  %v284_v2 = vpop.f32.mrb[6].mxu1 }
 0x104   :  { %v286_v3 = vpop.f32.mrb[7].mxu1  ;;  %v535_v4 = vpop.f32.mrb[4].mxu0 }
 0x105   :  { %v536_v5 = vadd.f32 %v535_v4, %v281_v0  ;;  %v537_v6 = vpop.f32.mrb[5].mxu0 }
 0x106   :  { %v538_v7 = vpop.f32.mrb[6].mxu0 }
 0x107   :  { %v592_v8 = vmax.f32 %v536_v5, 0.0  ;;  %v539_v9 = vadd.f32 %v538_v7, %v284_v2  ;;  %v540_v10 = vpop.f32.mrb[7].mxu0 }
 0x109   :  { %608 = vst [vmem:[%s1043_s4 + $0x10] sm:$0xff] %v592_v8  ;;  %v593_v11 = vmax.f32 %v539_v9, 0.0  ;;  %v289_v12 = vpop.f32.mrb[8].mxu1 }
 0x10a   :  { %v291_v13 = vpop.f32.mrb[9].mxu1 }
 0x10b   :  { %609 = vst [vmem:[%s1043_s4 + $0x18] sm:$0xff] %v593_v11  ;;  %v292_v14 = vpop.f32.mrb[10].mxu1 }
 0x10c   :  { %v294_v15 = vpop.f32.mrb[11].mxu1  ;;  %v543_v16 = vpop.f32.mrb[8].mxu0 }
 0x10d   :  { %v544_v17 = vadd.f32 %v543_v16, %v289_v12  ;;  %v545_v18 = vpop.f32.mrb[9].mxu0 }
 0x10e   :  { %v546_v19 = vpop.f32.mrb[10].mxu0 }
 0x10f   :  { %v594_v20 = vmax.f32 %v544_v17, 0.0  ;;  %v547_v21 = vadd.f32 %v546_v19, %v292_v14  ;;  %v548_v22 = vpop.f32.mrb[11].mxu0 }
 0x111   :  { %610 = vst [vmem:[%s1043_s4 + $0x20] sm:$0xff] %v594_v20  ;;  %v595_v23 = vmax.f32 %v547_v21, 0.0  ;;  %v297_v24 = vpop.f32.mrb[12].mxu1 }
 0x112   :  { %v299_v25 = vpop.f32.mrb[13].mxu1 }
 0x113   :  { %611 = vst [vmem:[%s1043_s4 + $0x28] sm:$0xff] %v595_v23  ;;  %v300_v26 = vpop.f32.mrb[14].mxu1 }
 0x114   :  { %v302_v27 = vpop.f32.mrb[15].mxu1  ;;  %v551_v28 = vpop.f32.mrb[12].mxu0 }
 0x115   :  { %v552_v29 = vadd.f32 %v551_v28, %v297_v24  ;;  %v553_v30 = vpop.f32.mrb[13].mxu0 }
 0x116   :  { %v554_v31 = vpop.f32.mrb[14].mxu0 }
 0x117   :  { %v596_v32 = vmax.f32 %v552_v29, 0.0  ;;  %v555_v33 = vadd.f32 %v554_v31, %v300_v26  ;;  %v556_v34 = vpop.f32.mrb[15].mxu0 }
 0x119   :  { %612 = vst [vmem:[%s1043_s4 + $0x30] sm:$0xff] %v596_v32  ;;  %v597_v35 = vmax.f32 %v555_v33, 0.0  ;;  %v305_v36 = vpop.f32.mrb[16].mxu1 }
 0x11a   :  { %v307_v37 = vpop.f32.mrb[17].mxu1 }
 0x11b   :  { %613 = vst [vmem:[%s1043_s4 + $0x38] sm:$0xff] %v597_v35  ;;  %v308_v38 = vpop.f32.mrb[18].mxu1 }
 0x11c   :  { %v310_v39 = vpop.f32.mrb[19].mxu1  ;;  %v559_v40 = vpop.f32.mrb[16].mxu0 }
 0x11d   :  { %v560_v41 = vadd.f32 %v559_v40, %v305_v36  ;;  %v561_v42 = vpop.f32.mrb[17].mxu0 }
 0x11e   :  { %v562_v43 = vpop.f32.mrb[18].mxu0 }
 0x11f   :  { %v598_v44 = vmax.f32 %v560_v41, 0.0  ;;  %v563_v45 = vadd.f32 %v562_v43, %v308_v38  ;;  %v564_v46 = vpop.f32.mrb[19].mxu0 }
 0x121   :  { %614 = vst [vmem:[%s1043_s4 + $0x40] sm:$0xff] %v598_v44  ;;  %v599_v47 = vmax.f32 %v563_v45, 0.0  ;;  %v313_v48 = vpop.f32.mrb[20].mxu1 }
 0x122   :  { %v315_v49 = vpop.f32.mrb[21].mxu1 }
 0x123   :  { %615 = vst [vmem:[%s1043_s4 + $0x48] sm:$0xff] %v599_v47  ;;  %v316_v50 = vpop.f32.mrb[22].mxu1 }
 0x124   :  { %v318_v51 = vpop.f32.mrb[23].mxu1  ;;  %v567_v52 = vpop.f32.mrb[20].mxu0 }
 0x125   :  { %v568_v53 = vadd.f32 %v567_v52, %v313_v48  ;;  %v569_v54 = vpop.f32.mrb[21].mxu0 }
 0x126   :  { %v570_v55 = vpop.f32.mrb[22].mxu0 }
 0x127   :  { %v600_v56 = vmax.f32 %v568_v53, 0.0  ;;  %v571_v57 = vadd.f32 %v570_v55, %v316_v50  ;;  %v572_v58 = vpop.f32.mrb[23].mxu0 }
 0x129   :  { %616 = vst [vmem:[%s1043_s4 + $0x50] sm:$0xff] %v600_v56  ;;  %v601_v59 = vmax.f32 %v571_v57, 0.0  ;;  %v321_v60 = vpop.f32.mrb[24].mxu1 }
 0x12a   :  { %v323_v61 = vpop.f32.mrb[25].mxu1 }
 0x12b   :  { %617 = vst [vmem:[%s1043_s4 + $0x58] sm:$0xff] %v601_v59  ;;  %v324_v62 = vpop.f32.mrb[26].mxu1 }
 0x12c   :  { %v326_v63 = vpop.f32.mrb[27].mxu1  ;;  %v575_v0 = vpop.f32.mrb[24].mxu0 }
 0x12d   :  { %v576_v1 = vadd.f32 %v575_v0, %v321_v60  ;;  %v577_v2 = vpop.f32.mrb[25].mxu0 }
 0x12e   :  { %v578_v3 = vpop.f32.mrb[26].mxu0 }
 0x12f   :  { %v602_v4 = vmax.f32 %v576_v1, 0.0  ;;  %v579_v5 = vadd.f32 %v578_v3, %v324_v62  ;;  %v580_v6 = vpop.f32.mrb[27].mxu0 }
 0x131   :  { %618 = vst [vmem:[%s1043_s4 + $0x60] sm:$0xff] %v602_v4  ;;  %v603_v7 = vmax.f32 %v579_v5, 0.0  ;;  %v329_v8 = vpop.f32.mrb[28].mxu1 }
 0x132   :  { %v331_v9 = vpop.f32.mrb[29].mxu1 }
 0x133   :  { %619 = vst [vmem:[%s1043_s4 + $0x68] sm:$0xff] %v603_v7  ;;  %v332_v10 = vpop.f32.mrb[30].mxu1 }
 0x134   :  { %v334_v11 = vpop.f32.mrb[31].mxu1  ;;  %v583_v12 = vpop.f32.mrb[28].mxu0 }
 0x135   :  { %v584_v13 = vadd.f32 %v583_v12, %v329_v8  ;;  %v585_v14 = vpop.f32.mrb[29].mxu0 }
 0x136   :  { %v586_v15 = vpop.f32.mrb[30].mxu0 }
 0x137   :  { %v604_v16 = vmax.f32 %v584_v13, 0.0  ;;  %v587_v17 = vadd.f32 %v586_v15, %v332_v10  ;;  %v588_v18 = vpop.f32.mrb[31].mxu0 }
 0x139   :  { %620 = vst [vmem:[%s1043_s4 + $0x70] sm:$0xff] %v604_v16  ;;  %v605_v19 = vmax.f32 %v587_v17, 0.0 }
 0x13b   :  { %621 = vst [vmem:[%s1043_s4 + $0x78] sm:$0xff] %v605_v19 }

// kernel: disp_resnet_forward.15
= control target key start
LH: loop header
LB: loop body
LE: loop exit
PB: predicated region body
PF: predicated region fallthrough
CT: control target
= control target key end

     0   :  { %s919_s9 = smov 0   ;;  %s1057_s0 = inlined_call_operand.vmem [shape: bf16[512,160], index: 0, kind: input, shape index: {}]   ;;  %s1058_s1 = inlined_call_operand.vmem [shape: bf16[160,128], index: 1, kind: input, shape index: {}]   ;;  %s1059_s2 = inlined_call_operand.vmem [shape: f32[512,128], index: 2, kind: output, shape index: {}]  }
   0x1 LB: > { %s737_s10 = sadd.s32 4294967295, %s901_s9   ;;  %p741_p0 = scmp.ge.s32.totalorder %s901_s9, 1  ;;  %s901_s9 = sphi %s919_s9, %s12_s9  }
   0x2   : > { %p114_p1 = scmp.lt.s32.totalorder %s901_s9, 3 }
   0x4   : > { %p115_p2 = pnand %p741_p0, %p114_p1 }
   0x5   : > { %v837_v0 = vld [vmem:[%s1058_s1] sm:$0xff] (!%p115_p2)   ;;  %v903_v1 = vmov (!%p115_p2), 0   ;;  %s742_s13 = sshll.u32 (!%p115_p2), %s737_s10, 5  ;;  %v838_v2 = vld [vmem:[%s1058_s1 + $0x8] sm:$0xff] (!%p115_p2)   ;;  %v839_v3 = vld [vmem:[%s1058_s1 + $0x10] sm:$0xff] (!%p115_p2)   ;;  %vm407_vm0 = vcmask (!%p115_p2), 261120  }
   0x6   : > { %118 = sbr.rel (%p115_p2) target bundleno = 319 (0x13f), region = 28  ;;  %456 = vmatprep.subr.bf16.mxu0 (!%p115_p2), %v903_v1  ;;  %808 = vmatprep.subr.bf16.mxu1 (!%p115_p2), %v903_v1  ;;  %p138_p3 = scmp.lt.s32.totalorder (!%p115_p2), %s742_s13, 63  ;;  %v840_v4 = vld [vmem:[%s1058_s1 + $0x18] sm:$0xff] (!%p115_p2)   ;;  %v841_v7 = vld [vmem:[%s1058_s1 + $0x20] sm:$0xff] (!%p115_p2)   ;;  %v842_v8 = vld [vmem:[%s1058_s1 + $0x28] sm:$0xff] (!%p115_p2)  }
   0x7   : > { %457 = vmatpush1.bf16.msra.mxu0 (!%p115_p2), %v837_v0  ;;  %818 = vmatpush1.bf16.msra.mxu1 (!%p115_p2), %v837_v0  ;;  %v843_v9 = vld [vmem:[%s1058_s1 + $0x30] sm:$0xff] (!%p115_p2)   ;;  %v844_v10 = vld [vmem:[%s1058_s1 + $0x38] sm:$0xff] (!%p115_p2)   ;;  %v845_v11 = vld [vmem:[%s1058_s1 + $0x40] sm:$0xff] (!%p115_p2)  }
   0x8   : > { %458 = vmatprep.subr.bf16.mxu0 (!%p115_p2), %v903_v1  ;;  %809 = vmatprep.subr.bf16.mxu1 (!%p115_p2), %v903_v1  ;;  %v846_v12 = vld [vmem:[%s1058_s1 + $0x48] sm:$0xff] (!%p115_p2)  }
   0xb   : > { %459 = vmatpush1.bf16.msra.mxu0 (!%p115_p2), %v838_v2  ;;  %819 = vmatpush1.bf16.msra.mxu1 (!%p115_p2), %v838_v2 }
   0xc   : > { %460 = vmatprep.subr.bf16.mxu0 (!%p115_p2), %v903_v1  ;;  %810 = vmatprep.subr.bf16.mxu1 (!%p115_p2), %v903_v1 }
   0xd   : > { %s1061_s13 = smov (!%p138_p3, %s742_s13), 63 }
   0xe   : > { %s807_s18 = sshll.u32 %s1061_s13, 3 }
   0xf   : > { %s944_s21 = scalar_lea.vmem %s1057_s0, %s807_s18  ;;  %461 = vmatpush1.bf16.msra.mxu0 %v839_v3  ;;  %820 = vmatpush1.bf16.msra.mxu1 %v839_v3  ;;  %s1020_s11 = scalar_lea.vmem %s1059_s2, %s807_s18 }
  0x10   : > { %462 = vmatprep.subr.bf16.mxu0 %v903_v1  ;;  %811 = vmatprep.subr.bf16.mxu1 %v903_v1  ;;  %v849_v5 = vld [vmem:[%s944_s21 + $0x4] ss:$8 sps:$4 sm:$0xff]   ;;  %v847_v13 = vld [vmem:[%s944_s21] ss:$8 sps:$4 sm:$0xff]   ;;  %v853_v15 = vld [vmem:[%s944_s21 + $0x14] ss:$8 sps:$4 sm:$0xff]  }
  0x11   : > { %v852_v6 = vld [vmem:[%s944_s21 + $0x84] ss:$8 sps:$4 sm:$0xff]   ;;  %789 = vmatprep.mubr.msk.bf16.mxu0 %vm407_vm0, %v849_v5  ;;  %v850_v14 = vld [vmem:[%s944_s21 + $0x80] ss:$8 sps:$4 sm:$0xff]   ;;  %v855_v16 = vld [vmem:[%s944_s21 + $0x94] ss:$8 sps:$4 sm:$0xff]  }
  0x12   : > { %797 = vmatprep.mubr.msk.bf16.mxu1 %vm407_vm0, %v852_v6  ;;  %v857_v17 = vld [vmem:[%s944_s21 + $0x10] ss:$8 sps:$4 sm:$0xff]   ;;  %v859_v19 = vld [vmem:[%s944_s21 + $0x24] ss:$8 sps:$4 sm:$0xff]   ;;  %v863_v21 = vld [vmem:[%s944_s21 + $0x20] ss:$8 sps:$4 sm:$0xff]  }
  0x13   : > { %463 = vmatpush1.bf16.msra.mxu0 %v840_v4  ;;  %821 = vmatpush1.bf16.msra.mxu1 %v840_v4  ;;  %v858_v18 = vld [vmem:[%s944_s21 + $0x90] ss:$8 sps:$4 sm:$0xff]   ;;  %v861_v20 = vld [vmem:[%s944_s21 + $0xa4] ss:$8 sps:$4 sm:$0xff]   ;;  %v864_v22 = vld [vmem:[%s944_s21 + $0xa0] ss:$8 sps:$4 sm:$0xff]  }
  0x14   : > { %464 = vmatprep.subr.bf16.mxu0 %v903_v1  ;;  %812 = vmatprep.subr.bf16.mxu1 %v903_v1  ;;  %v865_v23 = vld [vmem:[%s944_s21 + $0x34] ss:$8 sps:$4 sm:$0xff]   ;;  %v869_v25 = vld [vmem:[%s944_s21 + $0x30] ss:$8 sps:$4 sm:$0xff]   ;;  %v871_v27 = vld [vmem:[%s944_s21 + $0x44] ss:$8 sps:$4 sm:$0xff]  }
  0x15   : > { %v867_v24 = vld [vmem:[%s944_s21 + $0xb4] ss:$8 sps:$4 sm:$0xff]   ;;  %v870_v26 = vld [vmem:[%s944_s21 + $0xb0] ss:$8 sps:$4 sm:$0xff]   ;;  %v873_v28 = vld [vmem:[%s944_s21 + $0xc4] ss:$8 sps:$4 sm:$0xff]  }
  0x16   : > { %v875_v29 = vld [vmem:[%s944_s21 + $0x40] ss:$8 sps:$4 sm:$0xff]   ;;  %v877_v31 = vld [vmem:[%s944_s21 + $0x54] ss:$8 sps:$4 sm:$0xff]   ;;  %v881_v33 = vld [vmem:[%s944_s21 + $0x50] ss:$8 sps:$4 sm:$0xff]  }
  0x17   : > { %465 = vmatpush1.bf16.msra.mxu0 %v841_v7  ;;  %822 = vmatpush1.bf16.msra.mxu1 %v841_v7  ;;  %v876_v30 = vld [vmem:[%s944_s21 + $0xc0] ss:$8 sps:$4 sm:$0xff]   ;;  %v879_v32 = vld [vmem:[%s944_s21 + $0xd4] ss:$8 sps:$4 sm:$0xff]   ;;  %v882_v34 = vld [vmem:[%s944_s21 + $0xd0] ss:$8 sps:$4 sm:$0xff]  }
  0x18   : > { %466 = vmatprep.subr.bf16.mxu0 %v903_v1  ;;  %813 = vmatprep.subr.bf16.mxu1 %v903_v1  ;;  %v883_v35 = vld [vmem:[%s944_s21 + $0x64] ss:$8 sps:$4 sm:$0xff]   ;;  %v887_v37 = vld [vmem:[%s944_s21 + $0x60] ss:$8 sps:$4 sm:$0xff]   ;;  %v889_v39 = vld [vmem:[%s944_s21 + $0x74] ss:$8 sps:$4 sm:$0xff]  }
  0x19   : > { %v885_v36 = vld [vmem:[%s944_s21 + $0xe4] ss:$8 sps:$4 sm:$0xff]   ;;  %v888_v38 = vld [vmem:[%s944_s21 + $0xe0] ss:$8 sps:$4 sm:$0xff]   ;;  %v891_v40 = vld [vmem:[%s944_s21 + $0xf4] ss:$8 sps:$4 sm:$0xff]  }
  0x1a   : > { %v893_v41 = vld [vmem:[%s944_s21 + $0x70] ss:$8 sps:$4 sm:$0xff]  }
  0x1b   : > { %467 = vmatpush1.bf16.msra.mxu0 %v842_v8  ;;  %823 = vmatpush1.bf16.msra.mxu1 %v842_v8  ;;  %v894_v42 = vld [vmem:[%s944_s21 + $0xf0] ss:$8 sps:$4 sm:$0xff]  }
  0x1c   : > { %468 = vmatprep.subr.bf16.mxu0 %v903_v1  ;;  %814 = vmatprep.subr.bf16.mxu1 %v903_v1 }
  0x1f   : > { %469 = vmatpush1.bf16.msra.mxu0 %v843_v9  ;;  %824 = vmatpush1.bf16.msra.mxu1 %v843_v9 }
  0x20   : > { %470 = vmatprep.subr.bf16.mxu0 %v903_v1  ;;  %815 = vmatprep.subr.bf16.mxu1 %v903_v1 }
  0x23   : > { %471 = vmatpush1.bf16.msra.mxu0 %v844_v10  ;;  %825 = vmatpush1.bf16.msra.mxu1 %v844_v10 }
  0x24   : > { %472 = vmatprep.subr.bf16.mxu0 %v903_v1  ;;  %816 = vmatprep.subr.bf16.mxu1 %v903_v1 }
  0x27   : > { %473 = vmatpush1.bf16.msra.mxu0 %v845_v11  ;;  %826 = vmatpush1.bf16.msra.mxu1 %v845_v11 }
  0x28   : > { %474 = vmatprep.subr.bf16.mxu0 %v903_v1  ;;  %817 = vmatprep.subr.bf16.mxu1 %v903_v1 }
  0x2b   : > { %475 = vmatpush1.bf16.msra.mxu0 %v846_v12  ;;  %827 = vmatpush1.bf16.msra.mxu1 %v846_v12 }
  0x2e   : > { %489 = vmatmul.mubr.bf16.vlgmr.msra.gmra.mrb[0].mxu0 %v847_v13  ;;  %553 = vmatmul.mubr.bf16.vlgmr.msra.gmra.mrb[0].mxu1 %v850_v14 }
  0x2f   : > { %790 = vmatprep.mubr.msk.bf16.mxu0 %vm407_vm0, %v853_v15  ;;  %798 = vmatprep.mubr.msk.bf16.mxu1 %vm407_vm0, %v855_v16 }
  0x36   : > { %497 = vmatmul.mubr.bf16.gmra.mrb[4].mxu0 %v857_v17  ;;  %561 = vmatmul.mubr.bf16.gmra.mrb[4].mxu1 %v858_v18 }
  0x37   : > { %791 = vmatprep.mubr.msk.bf16.mxu0 %vm407_vm0, %v859_v19  ;;  %799 = vmatprep.mubr.msk.bf16.mxu1 %vm407_vm0, %v861_v20 }
  0x3e   : > { %505 = vmatmul.mubr.bf16.gmra.mrb[8].mxu0 %v863_v21  ;;  %569 = vmatmul.mubr.bf16.gmra.mrb[8].mxu1 %v864_v22 }
  0x3f   : > { %792 = vmatprep.mubr.msk.bf16.mxu0 %vm407_vm0, %v865_v23  ;;  %800 = vmatprep.mubr.msk.bf16.mxu1 %vm407_vm0, %v867_v24 }
  0x46   : > { %513 = vmatmul.mubr.bf16.gmra.mrb[12].mxu0 %v869_v25  ;;  %577 = vmatmul.mubr.bf16.gmra.mrb[12].mxu1 %v870_v26 }
  0x47   : > { %793 = vmatprep.mubr.msk.bf16.mxu0 %vm407_vm0, %v871_v27  ;;  %801 = vmatprep.mubr.msk.bf16.mxu1 %vm407_vm0, %v873_v28 }
  0x4e   : > { %521 = vmatmul.mubr.bf16.gmra.mrb[16].mxu0 %v875_v29  ;;  %585 = vmatmul.mubr.bf16.gmra.mrb[16].mxu1 %v876_v30 }
  0x4f   : > { %794 = vmatprep.mubr.msk.bf16.mxu0 %vm407_vm0, %v877_v31  ;;  %802 = vmatprep.mubr.msk.bf16.mxu1 %vm407_vm0, %v879_v32 }
  0x56   : > { %529 = vmatmul.mubr.bf16.gmra.mrb[20].mxu0 %v881_v33  ;;  %593 = vmatmul.mubr.bf16.gmra.mrb[20].mxu1 %v882_v34 }
  0x57   : > { %795 = vmatprep.mubr.msk.bf16.mxu0 %vm407_vm0, %v883_v35  ;;  %803 = vmatprep.mubr.msk.bf16.mxu1 %vm407_vm0, %v885_v36 }
  0x5e   : > { %537 = vmatmul.mubr.bf16.gmra.mrb[24].mxu0 %v887_v37  ;;  %601 = vmatmul.mubr.bf16.gmra.mrb[24].mxu1 %v888_v38 }
  0x5f   : > { %796 = vmatprep.mubr.msk.bf16.mxu0 %vm407_vm0, %v889_v39  ;;  %804 = vmatprep.mubr.msk.bf16.mxu1 %vm407_vm0, %v891_v40 }
  0x66   : > { %545 = vmatmul.mubr.bf16.gmra.mrb[28].mxu0 %v893_v41  ;;  %609 = vmatmul.mubr.bf16.gmra.mrb[28].mxu1 %v894_v42 }
 0x101   : > { %v490_v43 = vpop.f32.mrb[0].mxu0  ;;  %v554_v44 = vpop.f32.mrb[0].mxu1 }
 0x102   : > { %v617_v45 = vmax.f32 %v490_v43, 0.0  ;;  %v633_v46 = vmax.f32 %v554_v44, 0.0  ;;  %v492_v47 = vpop.f32.mrb[1].mxu0  ;;  %v556_v48 = vpop.f32.mrb[1].mxu1 }
 0x103   : > { %v493_v49 = vpop.f32.mrb[2].mxu0  ;;  %v557_v50 = vpop.f32.mrb[2].mxu1 }
 0x104   : > { %649 = vst [vmem:[%s1020_s11] sm:$0xff] %v617_v45  ;;  %665 = vst [vmem:[%s1020_s11 + $0x80] sm:$0xff] %v633_v46  ;;  %v618_v51 = vmax.f32 %v493_v49, 0.0  ;;  %v634_v52 = vmax.f32 %v557_v50, 0.0  ;;  %v495_v53 = vpop.f32.mrb[3].mxu0  ;;  %v559_v54 = vpop.f32.mrb[3].mxu1 }
 0x106   : > { %650 = vst [vmem:[%s1020_s11 + $0x8] sm:$0xff] %v618_v51  ;;  %666 = vst [vmem:[%s1020_s11 + $0x88] sm:$0xff] %v634_v52 }
 0x109   : > { %v498_v55 = vpop.f32.mrb[4].mxu0  ;;  %v562_v56 = vpop.f32.mrb[4].mxu1 }
 0x10a   : > { %v619_v57 = vmax.f32 %v498_v55, 0.0  ;;  %v635_v58 = vmax.f32 %v562_v56, 0.0  ;;  %v500_v59 = vpop.f32.mrb[5].mxu0  ;;  %v564_v60 = vpop.f32.mrb[5].mxu1 }
 0x10b   : > { %v501_v61 = vpop.f32.mrb[6].mxu0  ;;  %v565_v62 = vpop.f32.mrb[6].mxu1 }
 0x10c   : > { %651 = vst [vmem:[%s1020_s11 + $0x10] sm:$0xff] %v619_v57  ;;  %667 = vst [vmem:[%s1020_s11 + $0x90] sm:$0xff] %v635_v58  ;;  %v620_v63 = vmax.f32 %v501_v61, 0.0  ;;  %v636_v0 = vmax.f32 %v565_v62, 0.0  ;;  %v503_v1 = vpop.f32.mrb[7].mxu0  ;;  %v567_v2 = vpop.f32.mrb[7].mxu1 }
 0x10e   : > { %652 = vst [vmem:[%s1020_s11 + $0x18] sm:$0xff] %v620_v63  ;;  %668 = vst [vmem:[%s1020_s11 + $0x98] sm:$0xff] %v636_v0 }
 0x111   : > { %v506_v3 = vpop.f32.mrb[8].mxu0  ;;  %v570_v4 = vpop.f32.mrb[8].mxu1 }
 0x112   : > { %v621_v5 = vmax.f32 %v506_v3, 0.0  ;;  %v637_v6 = vmax.f32 %v570_v4, 0.0  ;;  %v508_v7 = vpop.f32.mrb[9].mxu0  ;;  %v572_v8 = vpop.f32.mrb[9].mxu1 }
 0x113   : > { %v509_v9 = vpop.f32.mrb[10].mxu0  ;;  %v573_v10 = vpop.f32.mrb[10].mxu1 }
 0x114   : > { %653 = vst [vmem:[%s1020_s11 + $0x20] sm:$0xff] %v621_v5  ;;  %669 = vst [vmem:[%s1020_s11 + $0xa0] sm:$0xff] %v637_v6  ;;  %v622_v11 = vmax.f32 %v509_v9, 0.0  ;;  %v638_v12 = vmax.f32 %v573_v10, 0.0  ;;  %v511_v13 = vpop.f32.mrb[11].mxu0  ;;  %v575_v14 = vpop.f32.mrb[11].mxu1 }
 0x116   : > { %654 = vst [vmem:[%s1020_s11 + $0x28] sm:$0xff] %v622_v11  ;;  %670 = vst [vmem:[%s1020_s11 + $0xa8] sm:$0xff] %v638_v12 }
 0x119   : > { %v514_v15 = vpop.f32.mrb[12].mxu0  ;;  %v578_v16 = vpop.f32.mrb[12].mxu1 }
 0x11a   : > { %v623_v17 = vmax.f32 %v514_v15, 0.0  ;;  %v639_v18 = vmax.f32 %v578_v16, 0.0  ;;  %v516_v19 = vpop.f32.mrb[13].mxu0  ;;  %v580_v20 = vpop.f32.mrb[13].mxu1 }
 0x11b   : > { %v517_v21 = vpop.f32.mrb[14].mxu0  ;;  %v581_v22 = vpop.f32.mrb[14].mxu1 }
 0x11c   : > { %655 = vst [vmem:[%s1020_s11 + $0x30] sm:$0xff] %v623_v17  ;;  %671 = vst [vmem:[%s1020_s11 + $0xb0] sm:$0xff] %v639_v18  ;;  %v624_v23 = vmax.f32 %v517_v21, 0.0  ;;  %v640_v24 = vmax.f32 %v581_v22, 0.0  ;;  %v519_v25 = vpop.f32.mrb[15].mxu0  ;;  %v583_v26 = vpop.f32.mrb[15].mxu1 }
 0x11e   : > { %656 = vst [vmem:[%s1020_s11 + $0x38] sm:$0xff] %v624_v23  ;;  %672 = vst [vmem:[%s1020_s11 + $0xb8] sm:$0xff] %v640_v24 }
 0x121   : > { %v522_v27 = vpop.f32.mrb[16].mxu0  ;;  %v586_v28 = vpop.f32.mrb[16].mxu1 }
 0x122   : > { %v625_v29 = vmax.f32 %v522_v27, 0.0  ;;  %v641_v30 = vmax.f32 %v586_v28, 0.0  ;;  %v524_v31 = vpop.f32.mrb[17].mxu0  ;;  %v588_v32 = vpop.f32.mrb[17].mxu1 }
 0x123   : > { %v525_v33 = vpop.f32.mrb[18].mxu0  ;;  %v589_v34 = vpop.f32.mrb[18].mxu1 }
 0x124   : > { %657 = vst [vmem:[%s1020_s11 + $0x40] sm:$0xff] %v625_v29  ;;  %673 = vst [vmem:[%s1020_s11 + $0xc0] sm:$0xff] %v641_v30  ;;  %v626_v35 = vmax.f32 %v525_v33, 0.0  ;;  %v642_v36 = vmax.f32 %v589_v34, 0.0  ;;  %v527_v37 = vpop.f32.mrb[19].mxu0  ;;  %v591_v38 = vpop.f32.mrb[19].mxu1 }
 0x126   : > { %658 = vst [vmem:[%s1020_s11 + $0x48] sm:$0xff] %v626_v35  ;;  %674 = vst [vmem:[%s1020_s11 + $0xc8] sm:$0xff] %v642_v36 }
 0x129   : > { %v530_v39 = vpop.f32.mrb[20].mxu0  ;;  %v594_v40 = vpop.f32.mrb[20].mxu1 }
 0x12a   : > { %v627_v41 = vmax.f32 %v530_v39, 0.0  ;;  %v643_v42 = vmax.f32 %v594_v40, 0.0  ;;  %v532_v43 = vpop.f32.mrb[21].mxu0  ;;  %v596_v44 = vpop.f32.mrb[21].mxu1 }
 0x12b   : > { %v533_v45 = vpop.f32.mrb[22].mxu0  ;;  %v597_v46 = vpop.f32.mrb[22].mxu1 }
 0x12c   : > { %659 = vst [vmem:[%s1020_s11 + $0x50] sm:$0xff] %v627_v41  ;;  %675 = vst [vmem:[%s1020_s11 + $0xd0] sm:$0xff] %v643_v42  ;;  %v628_v47 = vmax.f32 %v533_v45, 0.0  ;;  %v644_v48 = vmax.f32 %v597_v46, 0.0  ;;  %v535_v49 = vpop.f32.mrb[23].mxu0  ;;  %v599_v50 = vpop.f32.mrb[23].mxu1 }
 0x12e   : > { %660 = vst [vmem:[%s1020_s11 + $0x58] sm:$0xff] %v628_v47  ;;  %676 = vst [vmem:[%s1020_s11 + $0xd8] sm:$0xff] %v644_v48 }
 0x131   : > { %v538_v51 = vpop.f32.mrb[24].mxu0  ;;  %v602_v52 = vpop.f32.mrb[24].mxu1 }
 0x132   : > { %v629_v53 = vmax.f32 %v538_v51, 0.0  ;;  %v645_v54 = vmax.f32 %v602_v52, 0.0  ;;  %v540_v55 = vpop.f32.mrb[25].mxu0  ;;  %v604_v56 = vpop.f32.mrb[25].mxu1 }
 0x133   : > { %v541_v57 = vpop.f32.mrb[26].mxu0  ;;  %v605_v58 = vpop.f32.mrb[26].mxu1 }
 0x134   : > { %661 = vst [vmem:[%s1020_s11 + $0x60] sm:$0xff] %v629_v53  ;;  %677 = vst [vmem:[%s1020_s11 + $0xe0] sm:$0xff] %v645_v54  ;;  %v630_v59 = vmax.f32 %v541_v57, 0.0  ;;  %v646_v60 = vmax.f32 %v605_v58, 0.0  ;;  %v543_v61 = vpop.f32.mrb[27].mxu0  ;;  %v607_v62 = vpop.f32.mrb[27].mxu1 }
 0x136   : > { %662 = vst [vmem:[%s1020_s11 + $0x68] sm:$0xff] %v630_v59  ;;  %678 = vst [vmem:[%s1020_s11 + $0xe8] sm:$0xff] %v646_v60 }
 0x139   : > { %v546_v63 = vpop.f32.mrb[28].mxu0  ;;  %v610_v0 = vpop.f32.mrb[28].mxu1 }
 0x13a   : > { %v631_v1 = vmax.f32 %v546_v63, 0.0  ;;  %v647_v2 = vmax.f32 %v610_v0, 0.0  ;;  %v548_v3 = vpop.f32.mrb[29].mxu0  ;;  %v612_v4 = vpop.f32.mrb[29].mxu1 }
 0x13b   : > { %v549_v5 = vpop.f32.mrb[30].mxu0  ;;  %v613_v6 = vpop.f32.mrb[30].mxu1 }
 0x13c   : > { %663 = vst [vmem:[%s1020_s11 + $0x70] sm:$0xff] %v631_v1  ;;  %679 = vst [vmem:[%s1020_s11 + $0xf0] sm:$0xff] %v647_v2  ;;  %v632_v7 = vmax.f32 %v549_v5, 0.0  ;;  %v648_v8 = vmax.f32 %v613_v6, 0.0  ;;  %v551_v9 = vpop.f32.mrb[31].mxu0  ;;  %v615_v10 = vpop.f32.mrb[31].mxu1 }
 0x13e   : > { %664 = vst [vmem:[%s1020_s11 + $0x78] sm:$0xff] %v632_v7  ;;  %680 = vst [vmem:[%s1020_s11 + $0xf8] sm:$0xff] %v648_v8 }
 0x13f PF: > { %s12_s9 = sadd.s32 1, %s901_s9  }
 0x140   : > { %p9_p4 = scmp.ge.s32.totalorder %s12_s9, 4  }
 0x142   :  { %11 = sbr.rel (!%p9_p4) target bundleno = 1 (0x1), region = 58 }

// kernel: disp_resnet_forward.16
= control target key start
LH: loop header
LB: loop body
LE: loop exit
PB: predicated region body
PF: predicated region fallthrough
CT: control target
= control target key end

     0   :  { %s799_s9 = smov 0   ;;  %s896_s0 = inlined_call_operand.vmem [shape: bf16[512,128], index: 0, kind: input, shape index: {}]   ;;  %s897_s1 = inlined_call_operand.vmem [shape: bf16[128,128], index: 1, kind: input, shape index: {}]   ;;  %s898_s2 = inlined_call_operand.vmem [shape: f32[512,128], index: 2, kind: output, shape index: {}]  }
   0x1 LB: > { %s621_s10 = sadd.s32 4294967295, %s782_s9   ;;  %p625_p0 = scmp.ge.s32.totalorder %s782_s9, 1  ;;  %s782_s9 = sphi %s799_s9, %s12_s9  }
   0x2   : > { %p113_p1 = scmp.lt.s32.totalorder %s782_s9, 3 }
   0x4   : > { %p114_p2 = pnand %p625_p0, %p113_p1 }
   0x5   : > { %v752_v0 = vld [vmem:[%s897_s1] sm:$0xff] (!%p114_p2)   ;;  %s626_s13 = sshll.u32 (!%p114_p2), %s621_s10, 5  ;;  %v753_v1 = vld [vmem:[%s897_s1 + $0x8] sm:$0xff] (!%p114_p2)   ;;  %v754_v2 = vld [vmem:[%s897_s1 + $0x10] sm:$0xff] (!%p114_p2)  }
   0x6   : > { %117 = sbr.rel (%p114_p2) target bundleno = 280 (0x118), region = 28  ;;  %p136_p3 = scmp.lt.s32.totalorder (!%p114_p2), %s626_s13, 63  ;;  %680 = vmatprep.subr.bf16.mxu0 (!%p114_p2), %v752_v0  ;;  %728 = vmatprep.subr.bf16.mxu1 (!%p114_p2), %v752_v0  ;;  %v755_v3 = vld [vmem:[%s897_s1 + $0x18] sm:$0xff] (!%p114_p2)   ;;  %v756_v6 = vld [vmem:[%s897_s1 + $0x20] sm:$0xff] (!%p114_p2)   ;;  %v757_v7 = vld [vmem:[%s897_s1 + $0x28] sm:$0xff] (!%p114_p2)  }
   0x7   : > { %681 = vmatpush3.bf16.msra.mxu0 (!%p114_p2), %v752_v0  ;;  %736 = vmatpush3.bf16.msra.mxu1 (!%p114_p2), %v752_v0  ;;  %v758_v8 = vld [vmem:[%s897_s1 + $0x30] sm:$0xff] (!%p114_p2)   ;;  %v759_v9 = vld [vmem:[%s897_s1 + $0x38] sm:$0xff] (!%p114_p2)  }
   0x8   : > { %682 = vmatprep.subr.bf16.mxu0 (!%p114_p2), %v753_v1  ;;  %729 = vmatprep.subr.bf16.mxu1 (!%p114_p2), %v753_v1 }
   0xb   : > { %683 = vmatpush3.bf16.msra.mxu0 (!%p114_p2), %v753_v1  ;;  %737 = vmatpush3.bf16.msra.mxu1 (!%p114_p2), %v753_v1 }
   0xc   : > { %684 = vmatprep.subr.bf16.mxu0 (!%p114_p2), %v754_v2  ;;  %730 = vmatprep.subr.bf16.mxu1 (!%p114_p2), %v754_v2 }
   0xd   : > { %s900_s13 = smov (!%p136_p3, %s626_s13), 63 }
   0xe   : > { %s627_s18 = sshll.u32 %s900_s13, 2  ;;  %s629_s4 = sshll.u32 %s900_s13, 3 }
   0xf   : > { %s822_s21 = scalar_lea.vmem %s896_s0, %s627_s18  ;;  %685 = vmatpush3.bf16.msra.mxu0 %v754_v2  ;;  %738 = vmatpush3.bf16.msra.mxu1 %v754_v2  ;;  %s859_s7 = scalar_lea.vmem %s898_s2, %s629_s4 }
  0x10   : > { %v760_v4 = vld [vmem:[%s822_s21] sm:$0xff]   ;;  %686 = vmatprep.subr.bf16.mxu0 %v755_v3  ;;  %731 = vmatprep.subr.bf16.mxu1 %v755_v3  ;;  %v762_v10 = vld [vmem:[%s822_s21 + $0x8] sm:$0xff]   ;;  %v764_v12 = vld [vmem:[%s822_s21 + $0x10] sm:$0xff]  }
  0x11   : > { %v761_v5 = vld [vmem:[%s822_s21 + $0x40] sm:$0xff]   ;;  %696 = vmatprep.mubr.bf16.mxu0 %v760_v4  ;;  %v763_v11 = vld [vmem:[%s822_s21 + $0x48] sm:$0xff]   ;;  %v765_v13 = vld [vmem:[%s822_s21 + $0x50] sm:$0xff]  }
  0x12   : > { %712 = vmatprep.mubr.bf16.mxu1 %v761_v5  ;;  %v766_v14 = vld [vmem:[%s822_s21 + $0x18] sm:$0xff]   ;;  %v768_v16 = vld [vmem:[%s822_s21 + $0x20] sm:$0xff]   ;;  %v770_v18 = vld [vmem:[%s822_s21 + $0x28] sm:$0xff]  }
  0x13   : > { %687 = vmatpush3.bf16.msra.mxu0 %v755_v3  ;;  %739 = vmatpush3.bf16.msra.mxu1 %v755_v3  ;;  %v767_v15 = vld [vmem:[%s822_s21 + $0x58] sm:$0xff]   ;;  %v769_v17 = vld [vmem:[%s822_s21 + $0x60] sm:$0xff]   ;;  %v771_v19 = vld [vmem:[%s822_s21 + $0x68] sm:$0xff]  }
  0x14   : > { %688 = vmatprep.subr.bf16.mxu0 %v756_v6  ;;  %732 = vmatprep.subr.bf16.mxu1 %v756_v6  ;;  %v772_v20 = vld [vmem:[%s822_s21 + $0x30] sm:$0xff]   ;;  %v774_v22 = vld [vmem:[%s822_s21 + $0x38] sm:$0xff]  }
  0x15   : > { %v773_v21 = vld [vmem:[%s822_s21 + $0x70] sm:$0xff]   ;;  %v775_v23 = vld [vmem:[%s822_s21 + $0x78] sm:$0xff]  }
  0x17   : > { %689 = vmatpush3.bf16.msra.mxu0 %v756_v6  ;;  %740 = vmatpush3.bf16.msra.mxu1 %v756_v6 }
  0x18   : > { %690 = vmatprep.subr.bf16.mxu0 %v757_v7  ;;  %733 = vmatprep.subr.bf16.mxu1 %v757_v7 }
  0x1b   : > { %691 = vmatpush3.bf16.msra.mxu0 %v757_v7  ;;  %741 = vmatpush3.bf16.msra.mxu1 %v757_v7 }
  0x1c   : > { %692 = vmatprep.subr.bf16.mxu0 %v758_v8  ;;  %734 = vmatprep.subr.bf16.mxu1 %v758_v8 }
  0x1f   : > { %693 = vmatpush3.bf16.msra.mxu0 %v758_v8  ;;  %742 = vmatpush3.bf16.msra.mxu1 %v758_v8 }
  0x20   : > { %694 = vmatprep.subr.bf16.mxu0 %v759_v9  ;;  %735 = vmatprep.subr.bf16.mxu1 %v759_v9 }
  0x23   : > { %695 = vmatpush3.bf16.msra.mxu0 %v759_v9  ;;  %743 = vmatpush3.bf16.msra.mxu1 %v759_v9 }
  0x26   : > { %697 = vmatmul.mubr.bf16.vlgmr.msra.gmra.mrb[0].mxu0 %v762_v10  ;;  %713 = vmatmul.mubr.bf16.vlgmr.msra.gmra.mrb[0].mxu1 %v763_v11 }
  0x27   : > { %700 = vmatprep.mubr.bf16.mxu0 %v764_v12  ;;  %716 = vmatprep.mubr.bf16.mxu1 %v765_v13 }
  0x2e   : > { %701 = vmatmul.mubr.bf16.gmra.mrb[4].mxu0 %v766_v14  ;;  %717 = vmatmul.mubr.bf16.gmra.mrb[4].mxu1 %v767_v15 }
  0x2f   : > { %704 = vmatprep.mubr.bf16.mxu0 %v768_v16  ;;  %720 = vmatprep.mubr.bf16.mxu1 %v769_v17 }
  0x36   : > { %705 = vmatmul.mubr.bf16.gmra.mrb[8].mxu0 %v770_v18  ;;  %721 = vmatmul.mubr.bf16.gmra.mrb[8].mxu1 %v771_v19 }
  0x37   : > { %708 = vmatprep.mubr.bf16.mxu0 %v772_v20  ;;  %724 = vmatprep.mubr.bf16.mxu1 %v773_v21 }
  0x3e   : > { %709 = vmatmul.mubr.bf16.gmra.mrb[12].mxu0 %v774_v22  ;;  %725 = vmatmul.mubr.bf16.gmra.mrb[12].mxu1 %v775_v23 }
  0xf9   : > { %v698_v24 = vpop.f32.mrb[0].mxu0  ;;  %v714_v25 = vpop.f32.mrb[0].mxu1 }
  0xfa   : > { %v503_v26 = vmax.f32 %v698_v24, 0.0  ;;  %v519_v27 = vmax.f32 %v714_v25, 0.0  ;;  %v374_v28 = vpop.f32.mrb[1].mxu0  ;;  %v438_v29 = vpop.f32.mrb[1].mxu1 }
  0xfb   : > { %v501_v30 = vmax.f32 %v374_v28, 0.0  ;;  %v517_v31 = vmax.f32 %v438_v29, 0.0  ;;  %v699_v32 = vpop.f32.mrb[2].mxu0  ;;  %v715_v33 = vpop.f32.mrb[2].mxu1 }
  0xfc   : > { %535 = vst [vmem:[%s859_s7 + $0x10] sm:$0xff] %v503_v26  ;;  %551 = vst [vmem:[%s859_s7 + $0x90] sm:$0xff] %v519_v27  ;;  %v504_v34 = vmax.f32 %v699_v32, 0.0  ;;  %v520_v35 = vmax.f32 %v715_v33, 0.0  ;;  %v377_v36 = vpop.f32.mrb[3].mxu0  ;;  %v441_v37 = vpop.f32.mrb[3].mxu1 }
  0xfd   : > { %533 = vst [vmem:[%s859_s7] sm:$0xff] %v501_v30  ;;  %549 = vst [vmem:[%s859_s7 + $0x80] sm:$0xff] %v517_v31  ;;  %v502_v38 = vmax.f32 %v377_v36, 0.0  ;;  %v518_v39 = vmax.f32 %v441_v37, 0.0 }
  0xfe   : > { %536 = vst [vmem:[%s859_s7 + $0x18] sm:$0xff] %v504_v34  ;;  %552 = vst [vmem:[%s859_s7 + $0x98] sm:$0xff] %v520_v35 }
  0xff   : > { %534 = vst [vmem:[%s859_s7 + $0x8] sm:$0xff] %v502_v38  ;;  %550 = vst [vmem:[%s859_s7 + $0x88] sm:$0xff] %v518_v39 }
 0x101   : > { %v702_v40 = vpop.f32.mrb[4].mxu0  ;;  %v718_v41 = vpop.f32.mrb[4].mxu1 }
 0x102   : > { %v507_v42 = vmax.f32 %v702_v40, 0.0  ;;  %v523_v43 = vmax.f32 %v718_v41, 0.0  ;;  %v390_v44 = vpop.f32.mrb[5].mxu0  ;;  %v454_v45 = vpop.f32.mrb[5].mxu1 }
 0x103   : > { %v505_v46 = vmax.f32 %v390_v44, 0.0  ;;  %v521_v47 = vmax.f32 %v454_v45, 0.0  ;;  %v703_v48 = vpop.f32.mrb[6].mxu0  ;;  %v719_v49 = vpop.f32.mrb[6].mxu1 }
 0x104   : > { %539 = vst [vmem:[%s859_s7 + $0x30] sm:$0xff] %v507_v42  ;;  %555 = vst [vmem:[%s859_s7 + $0xb0] sm:$0xff] %v523_v43  ;;  %v508_v50 = vmax.f32 %v703_v48, 0.0  ;;  %v524_v51 = vmax.f32 %v719_v49, 0.0  ;;  %v393_v52 = vpop.f32.mrb[7].mxu0  ;;  %v457_v53 = vpop.f32.mrb[7].mxu1 }
 0x105   : > { %537 = vst [vmem:[%s859_s7 + $0x20] sm:$0xff] %v505_v46  ;;  %553 = vst [vmem:[%s859_s7 + $0xa0] sm:$0xff] %v521_v47  ;;  %v506_v54 = vmax.f32 %v393_v52, 0.0  ;;  %v522_v55 = vmax.f32 %v457_v53, 0.0 }
 0x106   : > { %540 = vst [vmem:[%s859_s7 + $0x38] sm:$0xff] %v508_v50  ;;  %556 = vst [vmem:[%s859_s7 + $0xb8] sm:$0xff] %v524_v51 }
 0x107   : > { %538 = vst [vmem:[%s859_s7 + $0x28] sm:$0xff] %v506_v54  ;;  %554 = vst [vmem:[%s859_s7 + $0xa8] sm:$0xff] %v522_v55 }
 0x109   : > { %v706_v56 = vpop.f32.mrb[8].mxu0  ;;  %v722_v57 = vpop.f32.mrb[8].mxu1 }
 0x10a   : > { %v511_v58 = vmax.f32 %v706_v56, 0.0  ;;  %v527_v59 = vmax.f32 %v722_v57, 0.0  ;;  %v406_v60 = vpop.f32.mrb[9].mxu0  ;;  %v470_v61 = vpop.f32.mrb[9].mxu1 }
 0x10b   : > { %v509_v62 = vmax.f32 %v406_v60, 0.0  ;;  %v525_v63 = vmax.f32 %v470_v61, 0.0  ;;  %v707_v0 = vpop.f32.mrb[10].mxu0  ;;  %v723_v1 = vpop.f32.mrb[10].mxu1 }
 0x10c   : > { %543 = vst [vmem:[%s859_s7 + $0x50] sm:$0xff] %v511_v58  ;;  %559 = vst [vmem:[%s859_s7 + $0xd0] sm:$0xff] %v527_v59  ;;  %v512_v2 = vmax.f32 %v707_v0, 0.0  ;;  %v528_v3 = vmax.f32 %v723_v1, 0.0  ;;  %v409_v4 = vpop.f32.mrb[11].mxu0  ;;  %v473_v5 = vpop.f32.mrb[11].mxu1 }
 0x10d   : > { %541 = vst [vmem:[%s859_s7 + $0x40] sm:$0xff] %v509_v62  ;;  %557 = vst [vmem:[%s859_s7 + $0xc0] sm:$0xff] %v525_v63  ;;  %v510_v6 = vmax.f32 %v409_v4, 0.0  ;;  %v526_v7 = vmax.f32 %v473_v5, 0.0 }
 0x10e   : > { %544 = vst [vmem:[%s859_s7 + $0x58] sm:$0xff] %v512_v2  ;;  %560 = vst [vmem:[%s859_s7 + $0xd8] sm:$0xff] %v528_v3 }
 0x10f   : > { %542 = vst [vmem:[%s859_s7 + $0x48] sm:$0xff] %v510_v6  ;;  %558 = vst [vmem:[%s859_s7 + $0xc8] sm:$0xff] %v526_v7 }
 0x111   : > { %v710_v8 = vpop.f32.mrb[12].mxu0  ;;  %v726_v9 = vpop.f32.mrb[12].mxu1 }
 0x112   : > { %v515_v10 = vmax.f32 %v710_v8, 0.0  ;;  %v531_v11 = vmax.f32 %v726_v9, 0.0  ;;  %v422_v12 = vpop.f32.mrb[13].mxu0  ;;  %v486_v13 = vpop.f32.mrb[13].mxu1 }
 0x113   : > { %v513_v14 = vmax.f32 %v422_v12, 0.0  ;;  %v529_v15 = vmax.f32 %v486_v13, 0.0  ;;  %v711_v16 = vpop.f32.mrb[14].mxu0  ;;  %v727_v17 = vpop.f32.mrb[14].mxu1 }
 0x114   : > { %547 = vst [vmem:[%s859_s7 + $0x70] sm:$0xff] %v515_v10  ;;  %563 = vst [vmem:[%s859_s7 + $0xf0] sm:$0xff] %v531_v11  ;;  %v516_v18 = vmax.f32 %v711_v16, 0.0  ;;  %v532_v19 = vmax.f32 %v727_v17, 0.0  ;;  %v425_v20 = vpop.f32.mrb[15].mxu0  ;;  %v489_v21 = vpop.f32.mrb[15].mxu1 }
 0x115   : > { %545 = vst [vmem:[%s859_s7 + $0x60] sm:$0xff] %v513_v14  ;;  %561 = vst [vmem:[%s859_s7 + $0xe0] sm:$0xff] %v529_v15  ;;  %v514_v22 = vmax.f32 %v425_v20, 0.0  ;;  %v530_v23 = vmax.f32 %v489_v21, 0.0 }
 0x116   : > { %548 = vst [vmem:[%s859_s7 + $0x78] sm:$0xff] %v516_v18  ;;  %564 = vst [vmem:[%s859_s7 + $0xf8] sm:$0xff] %v532_v19 }
 0x117   : > { %546 = vst [vmem:[%s859_s7 + $0x68] sm:$0xff] %v514_v22  ;;  %562 = vst [vmem:[%s859_s7 + $0xe8] sm:$0xff] %v530_v23 }
 0x118 PF: > { %s12_s9 = sadd.s32 1, %s782_s9  }
 0x119   : > { %p9_p4 = scmp.ge.s32.totalorder %s12_s9, 4  }
 0x11b   :  { %11 = sbr.rel (!%p9_p4) target bundleno = 1 (0x1), region = 58 }

// kernel: disp_resnet_forward.17
= control target key start
LH: loop header
LB: loop body
LE: loop exit
PB: predicated region body
PF: predicated region fallthrough
CT: control target
= control target key end

     0   :  { %s1119_s9 = smov 0   ;;  %s1237_s0 = inlined_call_operand.vmem [shape: bf16[512,128], index: 0, kind: input, shape index: {}]   ;;  %s1238_s1 = inlined_call_operand.vmem [shape: bf16[128,128], index: 1, kind: input, shape index: {}]   ;;  %s1239_s2 = inlined_call_operand.vmem [shape: f32[512,128], index: 2, kind: output, shape index: {}]  }
   0x1 LB: > { %s781_s10 = sadd.s32 4294967295, %s1102_s9   ;;  %p785_p0 = scmp.ge.s32.totalorder %s1102_s9, 1  ;;  %s1102_s9 = sphi %s1119_s9, %s12_s9  }
   0x2   : > { %p113_p1 = scmp.lt.s32.totalorder %s1102_s9, 3 }
   0x4   : > { %p114_p2 = pnand %p785_p0, %p113_p1 }
   0x5   : > { %v944_v0 = vld [vmem:[%s1238_s1] sm:$0xff] (!%p114_p2)   ;;  %s786_s13 = sshll.u32 (!%p114_p2), %s781_s10, 5  ;;  %v945_v1 = vld [vmem:[%s1238_s1 + $0x8] sm:$0xff] (!%p114_p2)   ;;  %v946_v2 = vld [vmem:[%s1238_s1 + $0x10] sm:$0xff] (!%p114_p2)  }
   0x6   : > { %117 = sbr.rel (%p114_p2) target bundleno = 336 (0x150), region = 28  ;;  %p136_p3 = scmp.lt.s32.totalorder (!%p114_p2), %s786_s13, 63  ;;  %872 = vmatprep.subr.bf16.mxu0 (!%p114_p2), %v944_v0  ;;  %920 = vmatprep.subr.bf16.mxu1 (!%p114_p2), %v944_v0  ;;  %v947_v3 = vld [vmem:[%s1238_s1 + $0x18] sm:$0xff] (!%p114_p2)   ;;  %v948_v6 = vld [vmem:[%s1238_s1 + $0x20] sm:$0xff] (!%p114_p2)   ;;  %v949_v7 = vld [vmem:[%s1238_s1 + $0x28] sm:$0xff] (!%p114_p2)  }
   0x7   : > { %873 = vmatpush3.bf16.msra.mxu0 (!%p114_p2), %v944_v0  ;;  %928 = vmatpush3.bf16.msra.mxu1 (!%p114_p2), %v944_v0  ;;  %v950_v8 = vld [vmem:[%s1238_s1 + $0x30] sm:$0xff] (!%p114_p2)   ;;  %v951_v9 = vld [vmem:[%s1238_s1 + $0x38] sm:$0xff] (!%p114_p2)  }
   0x8   : > { %874 = vmatprep.subr.bf16.mxu0 (!%p114_p2), %v945_v1  ;;  %921 = vmatprep.subr.bf16.mxu1 (!%p114_p2), %v945_v1 }
   0xb   : > { %875 = vmatpush3.bf16.msra.mxu0 (!%p114_p2), %v945_v1  ;;  %929 = vmatpush3.bf16.msra.mxu1 (!%p114_p2), %v945_v1 }
   0xc   : > { %876 = vmatprep.subr.bf16.mxu0 (!%p114_p2), %v946_v2  ;;  %922 = vmatprep.subr.bf16.mxu1 (!%p114_p2), %v946_v2 }
   0xd   : > { %s1241_s13 = smov (!%p136_p3, %s786_s13), 63 }
   0xe   : > { %s787_s18 = sshll.u32 %s1241_s13, 2  ;;  %s789_s4 = sshll.u32 %s1241_s13, 3 }
   0xf   : > { %s1142_s21 = scalar_lea.vmem %s1237_s0, %s787_s18  ;;  %877 = vmatpush3.bf16.msra.mxu0 %v946_v2  ;;  %930 = vmatpush3.bf16.msra.mxu1 %v946_v2  ;;  %s1181_s7 = scalar_lea.vmem %s1239_s2, %s789_s4 }
  0x10   : > { %v952_v4 = vld [vmem:[%s1142_s21] sm:$0xff]   ;;  %878 = vmatprep.subr.bf16.mxu0 %v947_v3  ;;  %923 = vmatprep.subr.bf16.mxu1 %v947_v3  ;;  %v954_v10 = vld [vmem:[%s1142_s21 + $0x8] sm:$0xff]   ;;  %v956_v12 = vld [vmem:[%s1142_s21 + $0x10] sm:$0xff]  }
  0x11   : > { %v953_v5 = vld [vmem:[%s1142_s21 + $0x40] sm:$0xff]   ;;  %888 = vmatprep.mubr.bf16.mxu0 %v952_v4  ;;  %v955_v11 = vld [vmem:[%s1142_s21 + $0x48] sm:$0xff]   ;;  %v957_v13 = vld [vmem:[%s1142_s21 + $0x50] sm:$0xff]  }
  0x12   : > { %904 = vmatprep.mubr.bf16.mxu1 %v953_v5  ;;  %v958_v14 = vld [vmem:[%s1142_s21 + $0x18] sm:$0xff]   ;;  %v960_v16 = vld [vmem:[%s1142_s21 + $0x20] sm:$0xff]   ;;  %v962_v18 = vld [vmem:[%s1142_s21 + $0x28] sm:$0xff]  }
  0x13   : > { %879 = vmatpush3.bf16.msra.mxu0 %v947_v3  ;;  %931 = vmatpush3.bf16.msra.mxu1 %v947_v3  ;;  %v959_v15 = vld [vmem:[%s1142_s21 + $0x58] sm:$0xff]   ;;  %v961_v17 = vld [vmem:[%s1142_s21 + $0x60] sm:$0xff]   ;;  %v963_v19 = vld [vmem:[%s1142_s21 + $0x68] sm:$0xff]  }
  0x14   : > { %880 = vmatprep.subr.bf16.mxu0 %v948_v6  ;;  %924 = vmatprep.subr.bf16.mxu1 %v948_v6  ;;  %v964_v20 = vld [vmem:[%s1142_s21 + $0x30] sm:$0xff]   ;;  %v966_v22 = vld [vmem:[%s1142_s21 + $0x38] sm:$0xff]  }
  0x15   : > { %v965_v21 = vld [vmem:[%s1142_s21 + $0x70] sm:$0xff]   ;;  %v967_v23 = vld [vmem:[%s1142_s21 + $0x78] sm:$0xff]  }
  0x17   : > { %881 = vmatpush3.bf16.msra.mxu0 %v948_v6  ;;  %932 = vmatpush3.bf16.msra.mxu1 %v948_v6 }
  0x18   : > { %882 = vmatprep.subr.bf16.mxu0 %v949_v7  ;;  %925 = vmatprep.subr.bf16.mxu1 %v949_v7 }
  0x1b   : > { %883 = vmatpush3.bf16.msra.mxu0 %v949_v7  ;;  %933 = vmatpush3.bf16.msra.mxu1 %v949_v7 }
  0x1c   : > { %884 = vmatprep.subr.bf16.mxu0 %v950_v8  ;;  %926 = vmatprep.subr.bf16.mxu1 %v950_v8 }
  0x1f   : > { %885 = vmatpush3.bf16.msra.mxu0 %v950_v8  ;;  %934 = vmatpush3.bf16.msra.mxu1 %v950_v8 }
  0x20   : > { %886 = vmatprep.subr.bf16.mxu0 %v951_v9  ;;  %927 = vmatprep.subr.bf16.mxu1 %v951_v9 }
  0x23   : > { %887 = vmatpush3.bf16.msra.mxu0 %v951_v9  ;;  %935 = vmatpush3.bf16.msra.mxu1 %v951_v9 }
  0x26   : > { %889 = vmatmul.mubr.bf16.vlgmr.msra.gmra.mrb[0].mxu0 %v954_v10  ;;  %905 = vmatmul.mubr.bf16.vlgmr.msra.gmra.mrb[0].mxu1 %v955_v11 }
  0x27   : > { %892 = vmatprep.mubr.bf16.mxu0 %v956_v12  ;;  %908 = vmatprep.mubr.bf16.mxu1 %v957_v13 }
  0x2e   : > { %893 = vmatmul.mubr.bf16.gmra.mrb[4].mxu0 %v958_v14  ;;  %909 = vmatmul.mubr.bf16.gmra.mrb[4].mxu1 %v959_v15 }
  0x2f   : > { %896 = vmatprep.mubr.bf16.mxu0 %v960_v16  ;;  %912 = vmatprep.mubr.bf16.mxu1 %v961_v17 }
  0x36   : > { %897 = vmatmul.mubr.bf16.gmra.mrb[8].mxu0 %v962_v18  ;;  %913 = vmatmul.mubr.bf16.gmra.mrb[8].mxu1 %v963_v19 }
  0x37   : > { %900 = vmatprep.mubr.bf16.mxu0 %v964_v20  ;;  %916 = vmatprep.mubr.bf16.mxu1 %v965_v21 }
  0x3e   : > { %901 = vmatmul.mubr.bf16.gmra.mrb[12].mxu0 %v966_v22  ;;  %917 = vmatmul.mubr.bf16.gmra.mrb[12].mxu1 %v967_v23 }
  0xf9   : > { %v890_v24 = vpop.f32.mrb[0].mxu0  ;;  %v906_v25 = vpop.f32.mrb[0].mxu1 }
  0xfa   : > { %v816_v26 = vmul.f32 -1.442695, %v890_v24  ;;  %v832_v27 = vmul.f32 -1.442695, %v906_v25  ;;  %v374_v28 = vpop.f32.mrb[1].mxu0  ;;  %v438_v29 = vpop.f32.mrb[1].mxu1 }
  0xfb   : > { %v814_v30 = vmul.f32 -1.442695, %v374_v28  ;;  %v830_v31 = vmul.f32 -1.442695, %v438_v29  ;;  %v891_v32 = vpop.f32.mrb[2].mxu0  ;;  %v907_v33 = vpop.f32.mrb[2].mxu1 }
  0xfc   : > { %968 = vpow2.f32 %v816_v26  ;;  %v817_v34 = vmul.f32 -1.442695, %v891_v32  ;;  %v377_v35 = vpop.f32.mrb[3].mxu0  ;;  %v441_v36 = vpop.f32.mrb[3].mxu1  ;;  %v833_v37 = vmul.f32 -1.442695, %v907_v33 }
  0xfd   : > { %970 = vpow2.f32 %v832_v27  ;;  %v815_v38 = vmul.f32 -1.442695, %v377_v35  ;;  %v831_v39 = vmul.f32 -1.442695, %v441_v36 }
  0xfe   : > { %972 = vpow2.f32 %v814_v30 }
  0xff   : > { %974 = vpow2.f32 %v830_v31 }
 0x100   : > { %976 = vpow2.f32 %v817_v34 }
 0x101   : > { %978 = vpow2.f32 %v833_v37  ;;  %v894_v40 = vpop.f32.mrb[4].mxu0  ;;  %v910_v41 = vpop.f32.mrb[4].mxu1 }
 0x102   : > { %980 = vpow2.f32 %v815_v38  ;;  %v820_v42 = vmul.f32 -1.442695, %v894_v40  ;;  %v836_v43 = vmul.f32 -1.442695, %v910_v41  ;;  %v390_v44 = vpop.f32.mrb[5].mxu0  ;;  %v454_v45 = vpop.f32.mrb[5].mxu1 }
 0x103   : > { %982 = vpow2.f32 %v831_v39  ;;  %v818_v46 = vmul.f32 -1.442695, %v390_v44  ;;  %v834_v47 = vmul.f32 -1.442695, %v454_v45  ;;  %v895_v48 = vpop.f32.mrb[6].mxu0  ;;  %v911_v49 = vpop.f32.mrb[6].mxu1 }
 0x104   : > { %984 = vpow2.f32 %v820_v42  ;;  %v821_v50 = vmul.f32 -1.442695, %v895_v48  ;;  %v393_v51 = vpop.f32.mrb[7].mxu0  ;;  %v457_v52 = vpop.f32.mrb[7].mxu1  ;;  %v837_v24 = vmul.f32 -1.442695, %v911_v49 }
 0x105   : > { %986 = vpow2.f32 %v836_v43  ;;  %v819_v28 = vmul.f32 -1.442695, %v393_v51  ;;  %v835_v32 = vmul.f32 -1.442695, %v457_v52 }
 0x106   : > { %v969_v53 = vpop.eup %968  ;;  %988 = vpow2.f32 %v818_v46 }
 0x107   : > { %v971_v54 = vpop.eup %970  ;;  %v599_v55 = vadd.f32 1.0, %v969_v53  ;;  %990 = vpow2.f32 %v834_v47 }
 0x108   : > { %v973_v56 = vpop.eup %972  ;;  %v615_v57 = vadd.f32 1.0, %v971_v54  ;;  %992 = vpow2.f32 %v821_v50 }
 0x109   : > { %v975_v58 = vpop.eup %974  ;;  %994 = vrcp.f32 %v599_v55  ;;  %v597_v59 = vadd.f32 1.0, %v973_v56  ;;  %v898_v60 = vpop.f32.mrb[8].mxu0 }
 0x10a   : > { %v914_v61 = vpop.f32.mrb[8].mxu1  ;;  %v977_v62 = vpop.eup %976  ;;  %996 = vrcp.f32 %v615_v57  ;;  %v613_v63 = vadd.f32 1.0, %v975_v58  ;;  %v824_v36 = vmul.f32 -1.442695, %v898_v60 }
 0x10b   : > { %v406_v0 = vpop.f32.mrb[9].mxu0  ;;  %v979_v1 = vpop.eup %978  ;;  %998 = vrcp.f32 %v597_v59  ;;  %v600_v2 = vadd.f32 1.0, %v977_v62  ;;  %v840_v39 = vmul.f32 -1.442695, %v914_v61 }
 0x10c   : > { %v470_v3 = vpop.f32.mrb[9].mxu1  ;;  %v899_v4 = vpop.f32.mrb[10].mxu0  ;;  %1000 = vrcp.f32 %v613_v63  ;;  %v616_v6 = vadd.f32 1.0, %v979_v1  ;;  %v822_v41 = vmul.f32 -1.442695, %v406_v0 }
 0x10d   : > { %v981_v5 = vpop.eup %980  ;;  %v915_v7 = vpop.f32.mrb[10].mxu1  ;;  %1002 = vrcp.f32 %v600_v2  ;;  %v838_v43 = vmul.f32 -1.442695, %v470_v3  ;;  %v825_v45 = vmul.f32 -1.442695, %v899_v4 }
 0x10e   : > { %v983_v8 = vpop.eup %982  ;;  %v598_v9 = vadd.f32 1.0, %v981_v5  ;;  %v409_v10 = vpop.f32.mrb[11].mxu0  ;;  %1004 = vrcp.f32 %v616_v6  ;;  %v841_v47 = vmul.f32 -1.442695, %v915_v7 }
 0x10f   : > { %v1175_v11 = vpop.f32.mrb[11].mxu1  ;;  %v985_v12 = vpop.eup %984  ;;  %v614_v13 = vadd.f32 1.0, %v983_v8  ;;  %v823_v49 = vmul.f32 -1.442695, %v409_v10 }
 0x110   : > { %v987_v14 = vpop.eup %986  ;;  %1006 = vrcp.f32 %v598_v9  ;;  %v603_v15 = vadd.f32 1.0, %v985_v12  ;;  %v839_v51 = vmul.f32 -1.442695, %v1175_v11 }
 0x111   : > { %v989_v16 = vpop.eup %988  ;;  %1008 = vrcp.f32 %v614_v13  ;;  %v619_v17 = vadd.f32 1.0, %v987_v14  ;;  %v902_v20 = vpop.f32.mrb[12].mxu0 }
 0x112   : > { %v991_v18 = vpop.eup %990  ;;  %1010 = vrcp.f32 %v603_v15  ;;  %v601_v19 = vadd.f32 1.0, %v989_v16  ;;  %v918_v21 = vpop.f32.mrb[12].mxu1  ;;  %v828_v53 = vmul.f32 -1.442695, %v902_v20 }
 0x113   : > { %v993_v22 = vpop.eup %992  ;;  %1012 = vrcp.f32 %v619_v17  ;;  %v617_v23 = vadd.f32 1.0, %v991_v18  ;;  %v1183_v25 = vpop.f32.mrb[13].mxu0  ;;  %v844_v55 = vmul.f32 -1.442695, %v918_v21 }
 0x114   : > { %v995_v26 = vpop.eup %994  ;;  %1014 = vrcp.f32 %v601_v19  ;;  %v604_v27 = vadd.f32 1.0, %v993_v22  ;;  %v1185_v29 = vpop.f32.mrb[13].mxu1  ;;  %v826_v18 = vmul.f32 -1.442695, %v1183_v25 }
 0x115   : > { %v1187_v30 = vpop.f32.mrb[14].mxu0  ;;  %v997_v31 = vpop.eup %996  ;;  %695 = vst [vmem:[%s1181_s7 + $0x10] sm:$0xff] %v995_v26  ;;  %1016 = vrcp.f32 %v617_v23  ;;  %v842_v21 = vmul.f32 -1.442695, %v1185_v29 }
 0x116   : > { %v1190_v33 = vpop.f32.mrb[14].mxu1  ;;  %v1192_v34 = vpop.f32.mrb[15].mxu0  ;;  %711 = vst [vmem:[%s1181_s7 + $0x90] sm:$0xff] %v997_v31  ;;  %1018 = vrcp.f32 %v604_v27  ;;  %v829_v23 = vmul.f32 -1.442695, %v1187_v30 }
 0x117   : > { %v999_v35 = vpop.eup %998  ;;  %v1195_v37 = vpop.f32.mrb[15].mxu1  ;;  %1020 = vpow2.f32 %v837_v24  ;;  %v845_v26 = vmul.f32 -1.442695, %v1190_v33  ;;  %v827_v27 = vmul.f32 -1.442695, %v1192_v34 }
 0x118   : > { %v1001_v38 = vpop.eup %1000  ;;  %693 = vst [vmem:[%s1181_s7] sm:$0xff] %v999_v35  ;;  %1022 = vpow2.f32 %v819_v28  ;;  %v843_v29 = vmul.f32 -1.442695, %v1195_v37 }
 0x119   : > { %v1003_v40 = vpop.eup %1002  ;;  %709 = vst [vmem:[%s1181_s7 + $0x80] sm:$0xff] %v1001_v38  ;;  %1024 = vpow2.f32 %v835_v32 }
 0x11a   : > { %v1005_v42 = vpop.eup %1004  ;;  %696 = vst [vmem:[%s1181_s7 + $0x18] sm:$0xff] %v1003_v40  ;;  %1026 = vpow2.f32 %v824_v36 }
 0x11b   : > { %v1007_v44 = vpop.eup %1006  ;;  %712 = vst [vmem:[%s1181_s7 + $0x98] sm:$0xff] %v1005_v42  ;;  %1028 = vpow2.f32 %v840_v39 }
 0x11c   : > { %v1009_v46 = vpop.eup %1008  ;;  %694 = vst [vmem:[%s1181_s7 + $0x8] sm:$0xff] %v1007_v44  ;;  %1030 = vpow2.f32 %v822_v41 }
 0x11d   : > { %v1011_v48 = vpop.eup %1010  ;;  %710 = vst [vmem:[%s1181_s7 + $0x88] sm:$0xff] %v1009_v46  ;;  %1032 = vpow2.f32 %v838_v43 }
 0x11e   : > { %v1013_v50 = vpop.eup %1012  ;;  %699 = vst [vmem:[%s1181_s7 + $0x30] sm:$0xff] %v1011_v48  ;;  %1034 = vpow2.f32 %v825_v45 }
 0x11f   : > { %v1015_v52 = vpop.eup %1014  ;;  %715 = vst [vmem:[%s1181_s7 + $0xb0] sm:$0xff] %v1013_v50  ;;  %1036 = vpow2.f32 %v841_v47 }
 0x120   : > { %v1017_v54 = vpop.eup %1016  ;;  %697 = vst [vmem:[%s1181_s7 + $0x20] sm:$0xff] %v1015_v52  ;;  %1038 = vpow2.f32 %v823_v49 }
 0x121   : > { %v1019_v56 = vpop.eup %1018  ;;  %713 = vst [vmem:[%s1181_s7 + $0xa0] sm:$0xff] %v1017_v54  ;;  %1040 = vpow2.f32 %v839_v51 }
 0x122   : > { %v1021_v57 = vpop.eup %1020  ;;  %700 = vst [vmem:[%s1181_s7 + $0x38] sm:$0xff] %v1019_v56  ;;  %1042 = vpow2.f32 %v828_v53 }
 0x123   : > { %v1023_v58 = vpop.eup %1022  ;;  %v620_v59 = vadd.f32 1.0, %v1021_v57  ;;  %1044 = vpow2.f32 %v844_v55 }
 0x124   : > { %v1025_v60 = vpop.eup %1024  ;;  %v602_v61 = vadd.f32 1.0, %v1023_v58 }
 0x125   : > { %v1027_v62 = vpop.eup %1026  ;;  %1046 = vrcp.f32 %v620_v59  ;;  %v618_v63 = vadd.f32 1.0, %v1025_v60 }
 0x126   : > { %v1029_v0 = vpop.eup %1028  ;;  %1048 = vrcp.f32 %v602_v61  ;;  %v607_v1 = vadd.f32 1.0, %v1027_v62 }
 0x127   : > { %v1031_v2 = vpop.eup %1030  ;;  %1050 = vrcp.f32 %v618_v63  ;;  %v623_v3 = vadd.f32 1.0, %v1029_v0 }
 0x128   : > { %v1033_v4 = vpop.eup %1032  ;;  %1052 = vrcp.f32 %v607_v1  ;;  %v605_v5 = vadd.f32 1.0, %v1031_v2 }
 0x129   : > { %v1035_v6 = vpop.eup %1034  ;;  %1054 = vrcp.f32 %v623_v3  ;;  %v621_v7 = vadd.f32 1.0, %v1033_v4 }
 0x12a   : > { %v1037_v8 = vpop.eup %1036  ;;  %1056 = vrcp.f32 %v605_v5  ;;  %v608_v9 = vadd.f32 1.0, %v1035_v6 }
 0x12b   : > { %v1039_v10 = vpop.eup %1038  ;;  %1058 = vrcp.f32 %v621_v7  ;;  %v624_v11 = vadd.f32 1.0, %v1037_v8 }
 0x12c   : > { %v1041_v12 = vpop.eup %1040  ;;  %1060 = vrcp.f32 %v608_v9  ;;  %v606_v13 = vadd.f32 1.0, %v1039_v10 }
 0x12d   : > { %v1043_v14 = vpop.eup %1042  ;;  %1062 = vrcp.f32 %v624_v11  ;;  %v622_v15 = vadd.f32 1.0, %v1041_v12 }
 0x12e   : > { %v1045_v16 = vpop.eup %1044  ;;  %1064 = vrcp.f32 %v606_v13  ;;  %v611_v17 = vadd.f32 1.0, %v1043_v14 }
 0x12f   : > { %v1047_v19 = vpop.eup %1046  ;;  %1066 = vrcp.f32 %v622_v15  ;;  %v627_v20 = vadd.f32 1.0, %v1045_v16 }
 0x130   : > { %v1049_v22 = vpop.eup %1048  ;;  %716 = vst [vmem:[%s1181_s7 + $0xb8] sm:$0xff] %v1047_v19  ;;  %1068 = vrcp.f32 %v611_v17 }
 0x131   : > { %v1051_v24 = vpop.eup %1050  ;;  %698 = vst [vmem:[%s1181_s7 + $0x28] sm:$0xff] %v1049_v22  ;;  %1070 = vrcp.f32 %v627_v20 }
 0x132   : > { %v1053_v25 = vpop.eup %1052  ;;  %714 = vst [vmem:[%s1181_s7 + $0xa8] sm:$0xff] %v1051_v24  ;;  %1072 = vpow2.f32 %v826_v18 }
 0x133   : > { %v1055_v28 = vpop.eup %1054  ;;  %703 = vst [vmem:[%s1181_s7 + $0x50] sm:$0xff] %v1053_v25  ;;  %1074 = vpow2.f32 %v842_v21 }
 0x134   : > { %v1057_v30 = vpop.eup %1056  ;;  %719 = vst [vmem:[%s1181_s7 + $0xd0] sm:$0xff] %v1055_v28  ;;  %1076 = vpow2.f32 %v829_v23 }
 0x135   : > { %v1059_v31 = vpop.eup %1058  ;;  %701 = vst [vmem:[%s1181_s7 + $0x40] sm:$0xff] %v1057_v30  ;;  %1078 = vpow2.f32 %v845_v26 }
 0x136   : > { %v1061_v32 = vpop.eup %1060  ;;  %717 = vst [vmem:[%s1181_s7 + $0xc0] sm:$0xff] %v1059_v31  ;;  %1080 = vpow2.f32 %v827_v27 }
 0x137   : > { %v1063_v33 = vpop.eup %1062  ;;  %704 = vst [vmem:[%s1181_s7 + $0x58] sm:$0xff] %v1061_v32  ;;  %1082 = vpow2.f32 %v843_v29 }
 0x138   : > { %v1065_v34 = vpop.eup %1064  ;;  %720 = vst [vmem:[%s1181_s7 + $0xd8] sm:$0xff] %v1063_v33 }
 0x139   : > { %v1067_v35 = vpop.eup %1066  ;;  %702 = vst [vmem:[%s1181_s7 + $0x48] sm:$0xff] %v1065_v34 }
 0x13a   : > { %v1069_v36 = vpop.eup %1068  ;;  %718 = vst [vmem:[%s1181_s7 + $0xc8] sm:$0xff] %v1067_v35 }
 0x13b   : > { %v1071_v37 = vpop.eup %1070  ;;  %707 = vst [vmem:[%s1181_s7 + $0x70] sm:$0xff] %v1069_v36 }
 0x13c   : > { %v1073_v38 = vpop.eup %1072  ;;  %723 = vst [vmem:[%s1181_s7 + $0xf0] sm:$0xff] %v1071_v37 }
 0x13d   : > { %v1075_v39 = vpop.eup %1074  ;;  %v609_v40 = vadd.f32 1.0, %v1073_v38 }
 0x13e   : > { %v1077_v41 = vpop.eup %1076  ;;  %v625_v42 = vadd.f32 1.0, %v1075_v39 }
 0x13f   : > { %v1079_v43 = vpop.eup %1078  ;;  %1084 = vrcp.f32 %v609_v40  ;;  %v612_v44 = vadd.f32 1.0, %v1077_v41 }
 0x140   : > { %v1081_v45 = vpop.eup %1080  ;;  %1086 = vrcp.f32 %v625_v42  ;;  %v628_v46 = vadd.f32 1.0, %v1079_v43 }
 0x141   : > { %v1083_v47 = vpop.eup %1082  ;;  %1088 = vrcp.f32 %v612_v44  ;;  %v610_v48 = vadd.f32 1.0, %v1081_v45 }
 0x142   : > { %1090 = vrcp.f32 %v628_v46  ;;  %v626_v49 = vadd.f32 1.0, %v1083_v47 }
 0x143   : > { %1092 = vrcp.f32 %v610_v48 }
 0x144   : > { %1094 = vrcp.f32 %v626_v49 }
 0x149   : > { %v1085_v50 = vpop.eup %1084 }
 0x14a   : > { %v1087_v51 = vpop.eup %1086  ;;  %705 = vst [vmem:[%s1181_s7 + $0x60] sm:$0xff] %v1085_v50 }
 0x14b   : > { %v1089_v52 = vpop.eup %1088  ;;  %721 = vst [vmem:[%s1181_s7 + $0xe0] sm:$0xff] %v1087_v51 }
 0x14c   : > { %v1091_v53 = vpop.eup %1090  ;;  %708 = vst [vmem:[%s1181_s7 + $0x78] sm:$0xff] %v1089_v52 }
 0x14d   : > { %v1093_v54 = vpop.eup %1092  ;;  %724 = vst [vmem:[%s1181_s7 + $0xf8] sm:$0xff] %v1091_v53 }
 0x14e   : > { %v1095_v55 = vpop.eup %1094  ;;  %706 = vst [vmem:[%s1181_s7 + $0x68] sm:$0xff] %v1093_v54 }
 0x14f   : > { %722 = vst [vmem:[%s1181_s7 + $0xe8] sm:$0xff] %v1095_v55 }
 0x150 PF: > { %s12_s9 = sadd.s32 1, %s1102_s9  }
 0x151   : > { %p9_p4 = scmp.ge.s32.totalorder %s12_s9, 4  }
 0x153   :  { %11 = sbr.rel (!%p9_p4) target bundleno = 1 (0x1), region = 58 }

</bundles_post_ra>
